<compile_context>
chip_gen: v7x
topology: tpu7x:2x2x1
jax: 0.10.0
libtpu: 0.0.40
codegen_flags: <defaults>
</compile_context>

<pallas_src>
import functools

import numpy as np
import jax
import jax.numpy as jnp
from jax import lax
from jax.experimental import pallas as pl
from jax.experimental.pallas import tpu as pltpu

_BN_EPS = 1e-5


def calculate_channels(L, kernel_size, stride, pad, n_convs):
    for _ in range(n_convs):
        L = (L - kernel_size + 2 * pad) // stride + 1
    return L


def _conv_out(L):
    return (L - 1) // 2 + 1


# -----------------------------------------------------------------------------
# Host-side packing of conv weights / selection matrices into matmul constants
# -----------------------------------------------------------------------------
def _pack_conv_weight(wconv, w_in, w_out):
    """(Cout, Cin, 3, 3) torch conv weight -> B[kh] of shape (w_in*Cin, w_out*Cout).

    Activation lanes are (mel, c) ordered.  The stride-2 / pad-1 taps along the
    mel axis and the channel contraction are folded into one matrix per time
    tap kh, so the conv becomes  y = sum_kh (S_kh @ x) @ B_kh.
    """
    c_out, c_in = wconv.shape[0], wconv.shape[1]
    b = np.zeros((3, w_in * c_in, w_out * c_out), np.float32)
    for kh in range(3):
        for j in range(w_out):
            for kw in range(3):
                w = 2 * j + kw - 1          # pad=1, stride=2 along mel
                if 0 <= w < w_in:
                    b[kh, w * c_in:(w + 1) * c_in, j * c_out:(j + 1) * c_out] = \
                        wconv[:, :, kh, kw].T
    return b


def _time_select(t_in, t_out, n):
    """Row-selection matrices S[kh]: (t_out*n, t_in*n), stride-2/pad-1 along time."""
    s = np.zeros((3, t_out, t_in), np.float32)
    for kh in range(3):
        for i in range(t_out):
            t = 2 * i + kh - 1
            if 0 <= t < t_in:
                s[kh, i, t] = 1.0
    eye = np.eye(n, dtype=np.float32)
    return np.stack([np.kron(s[kh], eye) for kh in range(3)])


def _channel_avg(w_out, c_out):
    """(w_out*c_out, w_out*c_out) lane-averaging matrix: mean over mel per channel."""
    return np.kron(np.full((w_out, w_out), 1.0 / w_out, np.float32),
                   np.eye(c_out, dtype=np.float32))


# -----------------------------------------------------------------------------
# Parameter init (random, PyTorch-like layouts, repacked for the kernel)
# -----------------------------------------------------------------------------
def init_params(key, idim, ref_enc_filters, ref_dim):
    chans = [1] + list(ref_enc_filters)
    widths = [idim]
    for _ in ref_enc_filters:
        widths.append(_conv_out(widths[-1]))

    convs = []
    for i in range(len(ref_enc_filters)):
        key, wk = jax.random.split(key)
        cin, cout = chans[i], chans[i + 1]
        fan_in = 9 * cin
        wconv = (jax.random.normal(wk, (cout, cin, 3, 3), jnp.float32)
                 / jnp.sqrt(jnp.float32(fan_in)))
        # Conv bias dropped: a per-channel constant cancels exactly in the
        # training-mode BatchNorm that follows (y - mean(y)).
        b = jnp.asarray(_pack_conv_weight(np.asarray(wconv), widths[i],
                                          widths[i + 1])).astype(jnp.bfloat16)
        p = jnp.asarray(_channel_avg(widths[i + 1], cout))
        gamma = jnp.ones((1, widths[i + 1] * cout), jnp.float32)   # per-(mel,c) lane
        beta = jnp.zeros((1, widths[i + 1] * cout), jnp.float32)
        convs.append((b, p, gamma, beta))

    m_last = widths[-1]
    c_last = ref_enc_filters[-1]
    d = m_last * c_last
    # PyTorch flattens (C, mel) channel-major; our lanes are (mel, c): permute
    # the Wih rows so the kernel consumes our layout directly.
    perm = np.array([c * m_last + w for w in range(m_last) for c in range(c_last)],
                    np.int32)

    s = 1.0 / float(np.sqrt(ref_dim))
    key, k1, k2, k3, k4 = jax.random.split(key, 5)
    wih_t = jax.random.uniform(k1, (3, ref_dim, d), jnp.float32, -s, s)       # torch (H, D)
    whh_t = jax.random.uniform(k2, (3, ref_dim, ref_dim), jnp.float32, -s, s)  # torch (H, H)
    bih = jax.random.uniform(k3, (3, 1, ref_dim), jnp.float32, -s, s)
    bhh = jax.random.uniform(k4, (3, 1, ref_dim), jnp.float32, -s, s)

    wih = jnp.transpose(wih_t, (0, 2, 1))[:, perm, :].astype(jnp.bfloat16)  # (3, D, H)
    whh = jnp.transpose(whh_t, (0, 2, 1))                                   # (3, H, H)
    return {"convs": convs, "gru": (wih, bih, whh, bhh)}


# -----------------------------------------------------------------------------
# Fused kernel: conv stack + BN + ReLU + GRU (last hidden)
# -----------------------------------------------------------------------------
def _make_kernel(n_layers, n_batch, t_out_final, hidden):
    def kernel(*refs):
        i = 0
        x_ref = refs[i]; i += 1
        layers = []
        for _ in range(n_layers):
            layers.append(refs[i:i + 5]); i += 5
        wih_ref, bih_ref, whh_ref, bhh_ref = refs[i:i + 4]; i += 4
        o_ref = refs[i]; i += 1
        gr_ref, gz_ref, gn_ref = refs[i:i + 3]

        act = x_ref[...]                                   # (T*N, mel*C), f32

        # ---- conv stack: conv(3x3,s2,p1) -> BN(batch stats) -> ReLU ----------
        for (s_ref, b_ref, p_ref, ga_ref, be_ref) in layers:
            r_out = s_ref.shape[1]
            l_out = b_ref.shape[2]
            y = jnp.zeros((r_out, l_out), jnp.float32)
            for kh in range(3):
                rows = jnp.dot(s_ref[kh], act,
                               preferred_element_type=jnp.float32)
                y = y + jnp.dot(rows.astype(jnp.bfloat16), b_ref[kh],
                                preferred_element_type=jnp.float32)
            # per-channel batch statistics over (t, n, mel)
            m1 = jnp.mean(y, axis=0, keepdims=True)
            m2 = jnp.mean(y * y, axis=0, keepdims=True)
            mu = jnp.dot(m1, p_ref[...], preferred_element_type=jnp.float32)
            ex2 = jnp.dot(m2, p_ref[...], preferred_element_type=jnp.float32)
            var = ex2 - mu * mu
            act = jnp.maximum((y - mu) * lax.rsqrt(var + _BN_EPS) * ga_ref[...]
                              + be_ref[...], 0.0)

        # ---- GRU: hoisted per-gate input projections (one matmul each) -------
        act_b = act.astype(jnp.bfloat16)
        gr_ref[...] = jnp.dot(act_b, wih_ref[0],
                              preferred_element_type=jnp.float32) + bih_ref[0]
        gz_ref[...] = jnp.dot(act_b, wih_ref[1],
                              preferred_element_type=jnp.float32) + bih_ref[1]
        gn_ref[...] = jnp.dot(act_b, wih_ref[2],
                              preferred_element_type=jnp.float32) + bih_ref[2]

        whh_r, whh_z, whh_n = whh_ref[0], whh_ref[1], whh_ref[2]
        bhh_r, bhh_z, bhh_n = bhh_ref[0], bhh_ref[1], bhh_ref[2]

        def step(t, h):
            gi_r = gr_ref[pl.ds(t * n_batch, n_batch), :]
            gi_z = gz_ref[pl.ds(t * n_batch, n_batch), :]
            gi_n = gn_ref[pl.ds(t * n_batch, n_batch), :]
            gh_r = jnp.dot(h, whh_r, preferred_element_type=jnp.float32) + bhh_r
            gh_z = jnp.dot(h, whh_z, preferred_element_type=jnp.float32) + bhh_z
            gh_n = jnp.dot(h, whh_n, preferred_element_type=jnp.float32) + bhh_n
            r = jax.nn.sigmoid(gi_r + gh_r)
            z = jax.nn.sigmoid(gi_z + gh_z)
            nn = jnp.tanh(gi_n + r * gh_n)
            return (1.0 - z) * nn + z * h

        h0 = jnp.zeros((n_batch, hidden), jnp.float32)
        h_t = lax.fori_loop(0, t_out_final, step, h0, unroll=True)
        o_ref[...] = h_t

    return kernel


# -----------------------------------------------------------------------------
# Forward wrapper
# -----------------------------------------------------------------------------
def reference_encoder_forward(inputs, params, idim):
    """inputs: (N, T, idim) (or anything reshapeable, as in the PyTorch .view)."""
    n = inputs.shape[0]
    x = inputs.reshape(n, -1, idim).astype(jnp.float32)          # (N, T, idim)
    t_in = x.shape[1]
    # time-major rows (t, n): the recurrence reads a contiguous N-row block per step
    x2 = jnp.transpose(x, (1, 0, 2)).reshape(t_in * n, idim)

    n_layers = len(params["convs"])
    t_sizes = [t_in]
    for _ in range(n_layers):
        t_sizes.append(_conv_out(t_sizes[-1]))
    t_out = t_sizes[-1]

    wih, bih, whh, bhh = params["gru"]
    hidden = whh.shape[-1]
    d_gru = wih.shape[1]

    flat_inputs = [x2]
    for li, (b, p, gamma, beta) in enumerate(params["convs"]):
        s = jnp.asarray(_time_select(t_sizes[li], t_sizes[li + 1], n))
        flat_inputs += [s, b, p, gamma, beta]
    flat_inputs += [wih, bih, whh, bhh]

    # rough cost hint for the XLA scheduler
    flops = 0
    for li in range(n_layers):
        ri, ro = t_sizes[li] * n, t_sizes[li + 1] * n
        lin = params["convs"][li][0].shape[1]
        lout = params["convs"][li][0].shape[2]
        flops += 3 * 2 * (ro * ri * lin + ro * lin * lout) + 2 * 2 * lout * lout
    flops += 3 * 2 * (t_out * n) * d_gru * hidden
    flops += t_out * 3 * 2 * n * hidden * hidden
    bytes_accessed = sum(int(a.size) * a.dtype.itemsize for a in flat_inputs)
    bytes_accessed += n * hidden * 4
    cost = pl.CostEstimate(flops=int(flops),
                           transcendentals=int(3 * t_out * n * hidden),
                           bytes_accessed=int(bytes_accessed))

    kernel = _make_kernel(n_layers, n, t_out, hidden)
    return pl.pallas_call(
        kernel,
        out_shape=jax.ShapeDtypeStruct((n, hidden), jnp.float32),
        in_specs=[pl.BlockSpec(memory_space=pltpu.MemorySpace.VMEM)
                  for _ in flat_inputs],
        out_specs=pl.BlockSpec(memory_space=pltpu.MemorySpace.VMEM),
        scratch_shapes=[pltpu.VMEM((t_out * n, hidden), jnp.float32)
                        for _ in range(3)],
        cost_estimate=cost,
    )(*flat_inputs)


# -----------------------------------------------------------------------------
if __name__ == "__main__":
    # Small, module-consistent configuration (downscaled ReferenceEncoder).
    N, T, idim = 2, 32, 32
    ref_enc_filters = [8, 8, 16, 16]
    ref_dim = 32

    key = jax.random.PRNGKey(0)
    key, xk = jax.random.split(key)
    x = jax.random.normal(xk, (N, T, idim), dtype=jnp.float32)
    params = init_params(key, idim, ref_enc_filters, ref_dim)

    fwd = jax.jit(functools.partial(reference_encoder_forward, idim=idim))
    out = fwd(x, params)
    out = jax.block_until_ready(out)
    assert out.shape == (N, ref_dim), out.shape
    assert bool(jnp.all(jnp.isfinite(out)))
    print("KERNEL_OK")
</pallas_src>

<mosaic_0001>
module attributes {stable_mosaic.version = 11 : i64} {
  func.func @kernel(%arg0: memref<64x32xf32, #tpu.memory_space<vmem>>, %arg1: memref<3x32x64xf32, #tpu.memory_space<vmem>>, %arg2: memref<3x32x128xbf16, #tpu.memory_space<vmem>>, %arg3: memref<128x128xf32, #tpu.memory_space<vmem>>, %arg4: memref<1x128xf32, #tpu.memory_space<vmem>>, %arg5: memref<1x128xf32, #tpu.memory_space<vmem>>, %arg6: memref<3x16x32xf32, #tpu.memory_space<vmem>>, %arg7: memref<3x128x64xbf16, #tpu.memory_space<vmem>>, %arg8: memref<64x64xf32, #tpu.memory_space<vmem>>, %arg9: memref<1x64xf32, #tpu.memory_space<vmem>>, %arg10: memref<1x64xf32, #tpu.memory_space<vmem>>, %arg11: memref<3x8x16xf32, #tpu.memory_space<vmem>>, %arg12: memref<3x64x64xbf16, #tpu.memory_space<vmem>>, %arg13: memref<64x64xf32, #tpu.memory_space<vmem>>, %arg14: memref<1x64xf32, #tpu.memory_space<vmem>>, %arg15: memref<1x64xf32, #tpu.memory_space<vmem>>, %arg16: memref<3x4x8xf32, #tpu.memory_space<vmem>>, %arg17: memref<3x64x32xbf16, #tpu.memory_space<vmem>>, %arg18: memref<32x32xf32, #tpu.memory_space<vmem>>, %arg19: memref<1x32xf32, #tpu.memory_space<vmem>>, %arg20: memref<1x32xf32, #tpu.memory_space<vmem>>, %arg21: memref<3x32x32xbf16, #tpu.memory_space<vmem>>, %arg22: memref<3x1x32xf32, #tpu.memory_space<vmem>>, %arg23: memref<3x32x32xf32, #tpu.memory_space<vmem>>, %arg24: memref<3x1x32xf32, #tpu.memory_space<vmem>>, %arg25: memref<2x32xf32, #tpu.memory_space<vmem>>, %arg26: memref<4x32xf32, #tpu.memory_space<vmem>>, %arg27: memref<4x32xf32, #tpu.memory_space<vmem>>, %arg28: memref<4x32xf32, #tpu.memory_space<vmem>>) attributes {dimension_semantics = [], scalar_prefetch = 0 : i64, scratch_operands = 3 : i64, tpu.core_type = #tpu.core_type<tc>} {
    %c0 = arith.constant 0 : index
    %c0_0 = arith.constant 0 : index
    %0 = vector.load %arg0[%c0, %c0_0] : memref<64x32xf32, #tpu.memory_space<vmem>>, vector<64x32xf32>
    %cst = arith.constant 0.000000e+00 : f32
    %1 = vector.broadcast %cst : f32 to vector<32x128xf32>
    %c0_1 = arith.constant 0 : index
    %c0_2 = arith.constant 0 : index
    %c0_3 = arith.constant 0 : index
    %2 = vector.load %arg1[%c0_1, %c0_2, %c0_3] : memref<3x32x64xf32, #tpu.memory_space<vmem>>, vector<1x32x64xf32>
    %3 = vector.shape_cast %2 : vector<1x32x64xf32> to vector<32x64xf32>
    %cst_4 = arith.constant dense<0.000000e+00> : vector<32x32xf32>
    %4 = tpu.matmul %3, %0, %cst_4 {dimension_numbers = #tpu.dot_dimension_numbers<[1], [0], [0], [1], [0, 0, 1, 1], [], []>} : vector<32x64xf32>, vector<64x32xf32>, vector<32x32xf32> -> vector<32x32xf32>
    %5 = arith.truncf %4 : vector<32x32xf32> to vector<32x32xbf16>
    %c0_5 = arith.constant 0 : index
    %c0_6 = arith.constant 0 : index
    %c0_7 = arith.constant 0 : index
    %6 = vector.load %arg2[%c0_5, %c0_6, %c0_7] : memref<3x32x128xbf16, #tpu.memory_space<vmem>>, vector<1x32x128xbf16>
    %7 = vector.shape_cast %6 : vector<1x32x128xbf16> to vector<32x128xbf16>
    %cst_8 = arith.constant dense<0.000000e+00> : vector<32x128xf32>
    %8 = tpu.matmul %5, %7, %cst_8 {dimension_numbers = #tpu.dot_dimension_numbers<[1], [0], [0], [1], [0, 0, 1, 1], [], []>} : vector<32x32xbf16>, vector<32x128xbf16>, vector<32x128xf32> -> vector<32x128xf32>
    %9 = arith.addf %1, %8 : vector<32x128xf32>
    %c1 = arith.constant 1 : index
    %c0_9 = arith.constant 0 : index
    %c0_10 = arith.constant 0 : index
    %10 = vector.load %arg1[%c1, %c0_9, %c0_10] : memref<3x32x64xf32, #tpu.memory_space<vmem>>, vector<1x32x64xf32>
    %11 = vector.shape_cast %10 : vector<1x32x64xf32> to vector<32x64xf32>
    %cst_11 = arith.constant dense<0.000000e+00> : vector<32x32xf32>
    %12 = tpu.matmul %11, %0, %cst_11 {dimension_numbers = #tpu.dot_dimension_numbers<[1], [0], [0], [1], [0, 0, 1, 1], [], []>} : vector<32x64xf32>, vector<64x32xf32>, vector<32x32xf32> -> vector<32x32xf32>
    %13 = arith.truncf %12 : vector<32x32xf32> to vector<32x32xbf16>
    %c1_12 = arith.constant 1 : index
    %c0_13 = arith.constant 0 : index
    %c0_14 = arith.constant 0 : index
    %14 = vector.load %arg2[%c1_12, %c0_13, %c0_14] : memref<3x32x128xbf16, #tpu.memory_space<vmem>>, vector<1x32x128xbf16>
    %15 = vector.shape_cast %14 : vector<1x32x128xbf16> to vector<32x128xbf16>
    %cst_15 = arith.constant dense<0.000000e+00> : vector<32x128xf32>
    %16 = tpu.matmul %13, %15, %cst_15 {dimension_numbers = #tpu.dot_dimension_numbers<[1], [0], [0], [1], [0, 0, 1, 1], [], []>} : vector<32x32xbf16>, vector<32x128xbf16>, vector<32x128xf32> -> vector<32x128xf32>
    %17 = arith.addf %9, %16 : vector<32x128xf32>
    %c2 = arith.constant 2 : index
    %c0_16 = arith.constant 0 : index
    %c0_17 = arith.constant 0 : index
    %18 = vector.load %arg1[%c2, %c0_16, %c0_17] : memref<3x32x64xf32, #tpu.memory_space<vmem>>, vector<1x32x64xf32>
    %19 = vector.shape_cast %18 : vector<1x32x64xf32> to vector<32x64xf32>
    %cst_18 = arith.constant dense<0.000000e+00> : vector<32x32xf32>
    %20 = tpu.matmul %19, %0, %cst_18 {dimension_numbers = #tpu.dot_dimension_numbers<[1], [0], [0], [1], [0, 0, 1, 1], [], []>} : vector<32x64xf32>, vector<64x32xf32>, vector<32x32xf32> -> vector<32x32xf32>
    %21 = arith.truncf %20 : vector<32x32xf32> to vector<32x32xbf16>
    %c2_19 = arith.constant 2 : index
    %c0_20 = arith.constant 0 : index
    %c0_21 = arith.constant 0 : index
    %22 = vector.load %arg2[%c2_19, %c0_20, %c0_21] : memref<3x32x128xbf16, #tpu.memory_space<vmem>>, vector<1x32x128xbf16>
    %23 = vector.shape_cast %22 : vector<1x32x128xbf16> to vector<32x128xbf16>
    %cst_22 = arith.constant dense<0.000000e+00> : vector<32x128xf32>
    %24 = tpu.matmul %21, %23, %cst_22 {dimension_numbers = #tpu.dot_dimension_numbers<[1], [0], [0], [1], [0, 0, 1, 1], [], []>} : vector<32x32xbf16>, vector<32x128xbf16>, vector<32x128xf32> -> vector<32x128xf32>
    %25 = arith.addf %17, %24 : vector<32x128xf32>
    %cst_23 = arith.constant dense<0.000000e+00> : vector<128xf32>
    %26 = vector.multi_reduction <add>, %25, %cst_23 [0] : vector<32x128xf32> to vector<128xf32>
    %27 = vector.shape_cast %26 : vector<128xf32> to vector<1x128xf32>
    %cst_24 = arith.constant 3.200000e+01 : f32
    %28 = vector.broadcast %cst_24 : f32 to vector<1x128xf32>
    %29 = arith.divf %27, %28 : vector<1x128xf32>
    %30 = arith.mulf %25, %25 : vector<32x128xf32>
    %cst_25 = arith.constant dense<0.000000e+00> : vector<128xf32>
    %31 = vector.multi_reduction <add>, %30, %cst_25 [0] : vector<32x128xf32> to vector<128xf32>
    %32 = vector.shape_cast %31 : vector<128xf32> to vector<1x128xf32>
    %cst_26 = arith.constant 3.200000e+01 : f32
    %33 = vector.broadcast %cst_26 : f32 to vector<1x128xf32>
    %34 = arith.divf %32, %33 : vector<1x128xf32>
    %c0_27 = arith.constant 0 : index
    %c0_28 = arith.constant 0 : index
    %35 = vector.load %arg3[%c0_27, %c0_28] : memref<128x128xf32, #tpu.memory_space<vmem>>, vector<128x128xf32>
    %cst_29 = arith.constant dense<0.000000e+00> : vector<1x128xf32>
    %36 = tpu.matmul %29, %35, %cst_29 {dimension_numbers = #tpu.dot_dimension_numbers<[1], [0], [0], [1], [0, 0, 1, 1], [], []>} : vector<1x128xf32>, vector<128x128xf32>, vector<1x128xf32> -> vector<1x128xf32>
    %c0_30 = arith.constant 0 : index
    %c0_31 = arith.constant 0 : index
    %37 = vector.load %arg3[%c0_30, %c0_31] : memref<128x128xf32, #tpu.memory_space<vmem>>, vector<128x128xf32>
    %cst_32 = arith.constant dense<0.000000e+00> : vector<1x128xf32>
    %38 = tpu.matmul %34, %37, %cst_32 {dimension_numbers = #tpu.dot_dimension_numbers<[1], [0], [0], [1], [0, 0, 1, 1], [], []>} : vector<1x128xf32>, vector<128x128xf32>, vector<1x128xf32> -> vector<1x128xf32>
    %39 = arith.mulf %36, %36 : vector<1x128xf32>
    %40 = arith.subf %38, %39 : vector<1x128xf32>
    %41 = vector.broadcast %36 : vector<1x128xf32> to vector<32x128xf32>
    %42 = arith.subf %25, %41 : vector<32x128xf32>
    %cst_33 = arith.constant 9.99999974E-6 : f32
    %43 = vector.broadcast %cst_33 : f32 to vector<1x128xf32>
    %44 = arith.addf %40, %43 : vector<1x128xf32>
    %45 = math.rsqrt %44 : vector<1x128xf32>
    %46 = vector.broadcast %45 : vector<1x128xf32> to vector<32x128xf32>
    %47 = arith.mulf %42, %46 : vector<32x128xf32>
    %c0_34 = arith.constant 0 : index
    %c0_35 = arith.constant 0 : index
    %48 = vector.load %arg4[%c0_34, %c0_35] : memref<1x128xf32, #tpu.memory_space<vmem>>, vector<1x128xf32>
    %49 = vector.broadcast %48 : vector<1x128xf32> to vector<32x128xf32>
    %50 = arith.mulf %47, %49 : vector<32x128xf32>
    %c0_36 = arith.constant 0 : index
    %c0_37 = arith.constant 0 : index
    %51 = vector.load %arg5[%c0_36, %c0_37] : memref<1x128xf32, #tpu.memory_space<vmem>>, vector<1x128xf32>
    %52 = vector.broadcast %51 : vector<1x128xf32> to vector<32x128xf32>
    %53 = arith.addf %50, %52 : vector<32x128xf32>
    %cst_38 = arith.constant 0.000000e+00 : f32
    %54 = vector.broadcast %cst_38 : f32 to vector<32x128xf32>
    %55 = arith.maximumf %53, %54 : vector<32x128xf32>
    %cst_39 = arith.constant 0.000000e+00 : f32
    %56 = vector.broadcast %cst_39 : f32 to vector<16x64xf32>
    %c0_40 = arith.constant 0 : index
    %c0_41 = arith.constant 0 : index
    %c0_42 = arith.constant 0 : index
    %57 = vector.load %arg6[%c0_40, %c0_41, %c0_42] : memref<3x16x32xf32, #tpu.memory_space<vmem>>, vector<1x16x32xf32>
    %58 = vector.shape_cast %57 : vector<1x16x32xf32> to vector<16x32xf32>
    %cst_43 = arith.constant dense<0.000000e+00> : vector<16x128xf32>
    %59 = tpu.matmul %58, %55, %cst_43 {dimension_numbers = #tpu.dot_dimension_numbers<[1], [0], [0], [1], [0, 0, 1, 1], [], []>} : vector<16x32xf32>, vector<32x128xf32>, vector<16x128xf32> -> vector<16x128xf32>
    %60 = arith.truncf %59 : vector<16x128xf32> to vector<16x128xbf16>
    %c0_44 = arith.constant 0 : index
    %c0_45 = arith.constant 0 : index
    %c0_46 = arith.constant 0 : index
    %61 = vector.load %arg7[%c0_44, %c0_45, %c0_46] : memref<3x128x64xbf16, #tpu.memory_space<vmem>>, vector<1x128x64xbf16>
    %62 = vector.shape_cast %61 : vector<1x128x64xbf16> to vector<128x64xbf16>
    %cst_47 = arith.constant dense<0.000000e+00> : vector<16x64xf32>
    %63 = tpu.matmul %60, %62, %cst_47 {dimension_numbers = #tpu.dot_dimension_numbers<[1], [0], [0], [1], [0, 0, 1, 1], [], []>} : vector<16x128xbf16>, vector<128x64xbf16>, vector<16x64xf32> -> vector<16x64xf32>
    %64 = arith.addf %56, %63 : vector<16x64xf32>
    %c1_48 = arith.constant 1 : index
    %c0_49 = arith.constant 0 : index
    %c0_50 = arith.constant 0 : index
    %65 = vector.load %arg6[%c1_48, %c0_49, %c0_50] : memref<3x16x32xf32, #tpu.memory_space<vmem>>, vector<1x16x32xf32>
    %66 = vector.shape_cast %65 : vector<1x16x32xf32> to vector<16x32xf32>
    %cst_51 = arith.constant dense<0.000000e+00> : vector<16x128xf32>
    %67 = tpu.matmul %66, %55, %cst_51 {dimension_numbers = #tpu.dot_dimension_numbers<[1], [0], [0], [1], [0, 0, 1, 1], [], []>} : vector<16x32xf32>, vector<32x128xf32>, vector<16x128xf32> -> vector<16x128xf32>
    %68 = arith.truncf %67 : vector<16x128xf32> to vector<16x128xbf16>
    %c1_52 = arith.constant 1 : index
    %c0_53 = arith.constant 0 : index
    %c0_54 = arith.constant 0 : index
    %69 = vector.load %arg7[%c1_52, %c0_53, %c0_54] : memref<3x128x64xbf16, #tpu.memory_space<vmem>>, vector<1x128x64xbf16>
    %70 = vector.shape_cast %69 : vector<1x128x64xbf16> to vector<128x64xbf16>
    %cst_55 = arith.constant dense<0.000000e+00> : vector<16x64xf32>
    %71 = tpu.matmul %68, %70, %cst_55 {dimension_numbers = #tpu.dot_dimension_numbers<[1], [0], [0], [1], [0, 0, 1, 1], [], []>} : vector<16x128xbf16>, vector<128x64xbf16>, vector<16x64xf32> -> vector<16x64xf32>
    %72 = arith.addf %64, %71 : vector<16x64xf32>
    %c2_56 = arith.constant 2 : index
    %c0_57 = arith.constant 0 : index
    %c0_58 = arith.constant 0 : index
    %73 = vector.load %arg6[%c2_56, %c0_57, %c0_58] : memref<3x16x32xf32, #tpu.memory_space<vmem>>, vector<1x16x32xf32>
    %74 = vector.shape_cast %73 : vector<1x16x32xf32> to vector<16x32xf32>
    %cst_59 = arith.constant dense<0.000000e+00> : vector<16x128xf32>
    %75 = tpu.matmul %74, %55, %cst_59 {dimension_numbers = #tpu.dot_dimension_numbers<[1], [0], [0], [1], [0, 0, 1, 1], [], []>} : vector<16x32xf32>, vector<32x128xf32>, vector<16x128xf32> -> vector<16x128xf32>
    %76 = arith.truncf %75 : vector<16x128xf32> to vector<16x128xbf16>
    %c2_60 = arith.constant 2 : index
    %c0_61 = arith.constant 0 : index
    %c0_62 = arith.constant 0 : index
    %77 = vector.load %arg7[%c2_60, %c0_61, %c0_62] : memref<3x128x64xbf16, #tpu.memory_space<vmem>>, vector<1x128x64xbf16>
    %78 = vector.shape_cast %77 : vector<1x128x64xbf16> to vector<128x64xbf16>
    %cst_63 = arith.constant dense<0.000000e+00> : vector<16x64xf32>
    %79 = tpu.matmul %76, %78, %cst_63 {dimension_numbers = #tpu.dot_dimension_numbers<[1], [0], [0], [1], [0, 0, 1, 1], [], []>} : vector<16x128xbf16>, vector<128x64xbf16>, vector<16x64xf32> -> vector<16x64xf32>
    %80 = arith.addf %72, %79 : vector<16x64xf32>
    %cst_64 = arith.constant dense<0.000000e+00> : vector<64xf32>
    %81 = vector.multi_reduction <add>, %80, %cst_64 [0] : vector<16x64xf32> to vector<64xf32>
    %82 = vector.shape_cast %81 : vector<64xf32> to vector<1x64xf32>
    %cst_65 = arith.constant 1.600000e+01 : f32
    %83 = vector.broadcast %cst_65 : f32 to vector<1x64xf32>
    %84 = arith.divf %82, %83 : vector<1x64xf32>
    %85 = arith.mulf %80, %80 : vector<16x64xf32>
    %cst_66 = arith.constant dense<0.000000e+00> : vector<64xf32>
    %86 = vector.multi_reduction <add>, %85, %cst_66 [0] : vector<16x64xf32> to vector<64xf32>
    %87 = vector.shape_cast %86 : vector<64xf32> to vector<1x64xf32>
    %cst_67 = arith.constant 1.600000e+01 : f32
    %88 = vector.broadcast %cst_67 : f32 to vector<1x64xf32>
    %89 = arith.divf %87, %88 : vector<1x64xf32>
    %c0_68 = arith.constant 0 : index
    %c0_69 = arith.constant 0 : index
    %90 = vector.load %arg8[%c0_68, %c0_69] : memref<64x64xf32, #tpu.memory_space<vmem>>, vector<64x64xf32>
    %cst_70 = arith.constant dense<0.000000e+00> : vector<1x64xf32>
    %91 = tpu.matmul %84, %90, %cst_70 {dimension_numbers = #tpu.dot_dimension_numbers<[1], [0], [0], [1], [0, 0, 1, 1], [], []>} : vector<1x64xf32>, vector<64x64xf32>, vector<1x64xf32> -> vector<1x64xf32>
    %c0_71 = arith.constant 0 : index
    %c0_72 = arith.constant 0 : index
    %92 = vector.load %arg8[%c0_71, %c0_72] : memref<64x64xf32, #tpu.memory_space<vmem>>, vector<64x64xf32>
    %cst_73 = arith.constant dense<0.000000e+00> : vector<1x64xf32>
    %93 = tpu.matmul %89, %92, %cst_73 {dimension_numbers = #tpu.dot_dimension_numbers<[1], [0], [0], [1], [0, 0, 1, 1], [], []>} : vector<1x64xf32>, vector<64x64xf32>, vector<1x64xf32> -> vector<1x64xf32>
    %94 = arith.mulf %91, %91 : vector<1x64xf32>
    %95 = arith.subf %93, %94 : vector<1x64xf32>
    %96 = vector.broadcast %91 : vector<1x64xf32> to vector<16x64xf32>
    %97 = arith.subf %80, %96 : vector<16x64xf32>
    %cst_74 = arith.constant 9.99999974E-6 : f32
    %98 = vector.broadcast %cst_74 : f32 to vector<1x64xf32>
    %99 = arith.addf %95, %98 : vector<1x64xf32>
    %100 = math.rsqrt %99 : vector<1x64xf32>
    %101 = vector.broadcast %100 : vector<1x64xf32> to vector<16x64xf32>
    %102 = arith.mulf %97, %101 : vector<16x64xf32>
    %c0_75 = arith.constant 0 : index
    %c0_76 = arith.constant 0 : index
    %103 = vector.load %arg9[%c0_75, %c0_76] : memref<1x64xf32, #tpu.memory_space<vmem>>, vector<1x64xf32>
    %104 = vector.broadcast %103 : vector<1x64xf32> to vector<16x64xf32>
    %105 = arith.mulf %102, %104 : vector<16x64xf32>
    %c0_77 = arith.constant 0 : index
    %c0_78 = arith.constant 0 : index
    %106 = vector.load %arg10[%c0_77, %c0_78] : memref<1x64xf32, #tpu.memory_space<vmem>>, vector<1x64xf32>
    %107 = vector.broadcast %106 : vector<1x64xf32> to vector<16x64xf32>
    %108 = arith.addf %105, %107 : vector<16x64xf32>
    %cst_79 = arith.constant 0.000000e+00 : f32
    %109 = vector.broadcast %cst_79 : f32 to vector<16x64xf32>
    %110 = arith.maximumf %108, %109 : vector<16x64xf32>
    %cst_80 = arith.constant 0.000000e+00 : f32
    %111 = vector.broadcast %cst_80 : f32 to vector<8x64xf32>
    %c0_81 = arith.constant 0 : index
    %c0_82 = arith.constant 0 : index
    %c0_83 = arith.constant 0 : index
    %112 = vector.load %arg11[%c0_81, %c0_82, %c0_83] : memref<3x8x16xf32, #tpu.memory_space<vmem>>, vector<1x8x16xf32>
    %113 = vector.shape_cast %112 : vector<1x8x16xf32> to vector<8x16xf32>
    %cst_84 = arith.constant dense<0.000000e+00> : vector<8x64xf32>
    %114 = tpu.matmul %113, %110, %cst_84 {dimension_numbers = #tpu.dot_dimension_numbers<[1], [0], [0], [1], [0, 0, 1, 1], [], []>} : vector<8x16xf32>, vector<16x64xf32>, vector<8x64xf32> -> vector<8x64xf32>
    %115 = arith.truncf %114 : vector<8x64xf32> to vector<8x64xbf16>
    %c0_85 = arith.constant 0 : index
    %c0_86 = arith.constant 0 : index
    %c0_87 = arith.constant 0 : index
    %116 = vector.load %arg12[%c0_85, %c0_86, %c0_87] : memref<3x64x64xbf16, #tpu.memory_space<vmem>>, vector<1x64x64xbf16>
    %117 = vector.shape_cast %116 : vector<1x64x64xbf16> to vector<64x64xbf16>
    %cst_88 = arith.constant dense<0.000000e+00> : vector<8x64xf32>
    %118 = tpu.matmul %115, %117, %cst_88 {dimension_numbers = #tpu.dot_dimension_numbers<[1], [0], [0], [1], [0, 0, 1, 1], [], []>} : vector<8x64xbf16>, vector<64x64xbf16>, vector<8x64xf32> -> vector<8x64xf32>
    %119 = arith.addf %111, %118 : vector<8x64xf32>
    %c1_89 = arith.constant 1 : index
    %c0_90 = arith.constant 0 : index
    %c0_91 = arith.constant 0 : index
    %120 = vector.load %arg11[%c1_89, %c0_90, %c0_91] : memref<3x8x16xf32, #tpu.memory_space<vmem>>, vector<1x8x16xf32>
    %121 = vector.shape_cast %120 : vector<1x8x16xf32> to vector<8x16xf32>
    %cst_92 = arith.constant dense<0.000000e+00> : vector<8x64xf32>
    %122 = tpu.matmul %121, %110, %cst_92 {dimension_numbers = #tpu.dot_dimension_numbers<[1], [0], [0], [1], [0, 0, 1, 1], [], []>} : vector<8x16xf32>, vector<16x64xf32>, vector<8x64xf32> -> vector<8x64xf32>
    %123 = arith.truncf %122 : vector<8x64xf32> to vector<8x64xbf16>
    %c1_93 = arith.constant 1 : index
    %c0_94 = arith.constant 0 : index
    %c0_95 = arith.constant 0 : index
    %124 = vector.load %arg12[%c1_93, %c0_94, %c0_95] : memref<3x64x64xbf16, #tpu.memory_space<vmem>>, vector<1x64x64xbf16>
    %125 = vector.shape_cast %124 : vector<1x64x64xbf16> to vector<64x64xbf16>
    %cst_96 = arith.constant dense<0.000000e+00> : vector<8x64xf32>
    %126 = tpu.matmul %123, %125, %cst_96 {dimension_numbers = #tpu.dot_dimension_numbers<[1], [0], [0], [1], [0, 0, 1, 1], [], []>} : vector<8x64xbf16>, vector<64x64xbf16>, vector<8x64xf32> -> vector<8x64xf32>
    %127 = arith.addf %119, %126 : vector<8x64xf32>
    %c2_97 = arith.constant 2 : index
    %c0_98 = arith.constant 0 : index
    %c0_99 = arith.constant 0 : index
    %128 = vector.load %arg11[%c2_97, %c0_98, %c0_99] : memref<3x8x16xf32, #tpu.memory_space<vmem>>, vector<1x8x16xf32>
    %129 = vector.shape_cast %128 : vector<1x8x16xf32> to vector<8x16xf32>
    %cst_100 = arith.constant dense<0.000000e+00> : vector<8x64xf32>
    %130 = tpu.matmul %129, %110, %cst_100 {dimension_numbers = #tpu.dot_dimension_numbers<[1], [0], [0], [1], [0, 0, 1, 1], [], []>} : vector<8x16xf32>, vector<16x64xf32>, vector<8x64xf32> -> vector<8x64xf32>
    %131 = arith.truncf %130 : vector<8x64xf32> to vector<8x64xbf16>
    %c2_101 = arith.constant 2 : index
    %c0_102 = arith.constant 0 : index
    %c0_103 = arith.constant 0 : index
    %132 = vector.load %arg12[%c2_101, %c0_102, %c0_103] : memref<3x64x64xbf16, #tpu.memory_space<vmem>>, vector<1x64x64xbf16>
    %133 = vector.shape_cast %132 : vector<1x64x64xbf16> to vector<64x64xbf16>
    %cst_104 = arith.constant dense<0.000000e+00> : vector<8x64xf32>
    %134 = tpu.matmul %131, %133, %cst_104 {dimension_numbers = #tpu.dot_dimension_numbers<[1], [0], [0], [1], [0, 0, 1, 1], [], []>} : vector<8x64xbf16>, vector<64x64xbf16>, vector<8x64xf32> -> vector<8x64xf32>
    %135 = arith.addf %127, %134 : vector<8x64xf32>
    %cst_105 = arith.constant dense<0.000000e+00> : vector<64xf32>
    %136 = vector.multi_reduction <add>, %135, %cst_105 [0] : vector<8x64xf32> to vector<64xf32>
    %137 = vector.shape_cast %136 : vector<64xf32> to vector<1x64xf32>
    %cst_106 = arith.constant 8.000000e+00 : f32
    %138 = vector.broadcast %cst_106 : f32 to vector<1x64xf32>
    %139 = arith.divf %137, %138 : vector<1x64xf32>
    %140 = arith.mulf %135, %135 : vector<8x64xf32>
    %cst_107 = arith.constant dense<0.000000e+00> : vector<64xf32>
    %141 = vector.multi_reduction <add>, %140, %cst_107 [0] : vector<8x64xf32> to vector<64xf32>
    %142 = vector.shape_cast %141 : vector<64xf32> to vector<1x64xf32>
    %cst_108 = arith.constant 8.000000e+00 : f32
    %143 = vector.broadcast %cst_108 : f32 to vector<1x64xf32>
    %144 = arith.divf %142, %143 : vector<1x64xf32>
    %c0_109 = arith.constant 0 : index
    %c0_110 = arith.constant 0 : index
    %145 = vector.load %arg13[%c0_109, %c0_110] : memref<64x64xf32, #tpu.memory_space<vmem>>, vector<64x64xf32>
    %cst_111 = arith.constant dense<0.000000e+00> : vector<1x64xf32>
    %146 = tpu.matmul %139, %145, %cst_111 {dimension_numbers = #tpu.dot_dimension_numbers<[1], [0], [0], [1], [0, 0, 1, 1], [], []>} : vector<1x64xf32>, vector<64x64xf32>, vector<1x64xf32> -> vector<1x64xf32>
    %c0_112 = arith.constant 0 : index
    %c0_113 = arith.constant 0 : index
    %147 = vector.load %arg13[%c0_112, %c0_113] : memref<64x64xf32, #tpu.memory_space<vmem>>, vector<64x64xf32>
    %cst_114 = arith.constant dense<0.000000e+00> : vector<1x64xf32>
    %148 = tpu.matmul %144, %147, %cst_114 {dimension_numbers = #tpu.dot_dimension_numbers<[1], [0], [0], [1], [0, 0, 1, 1], [], []>} : vector<1x64xf32>, vector<64x64xf32>, vector<1x64xf32> -> vector<1x64xf32>
    %149 = arith.mulf %146, %146 : vector<1x64xf32>
    %150 = arith.subf %148, %149 : vector<1x64xf32>
    %151 = vector.broadcast %146 : vector<1x64xf32> to vector<8x64xf32>
    %152 = arith.subf %135, %151 : vector<8x64xf32>
    %cst_115 = arith.constant 9.99999974E-6 : f32
    %153 = vector.broadcast %cst_115 : f32 to vector<1x64xf32>
    %154 = arith.addf %150, %153 : vector<1x64xf32>
    %155 = math.rsqrt %154 : vector<1x64xf32>
    %156 = vector.broadcast %155 : vector<1x64xf32> to vector<8x64xf32>
    %157 = arith.mulf %152, %156 : vector<8x64xf32>
    %c0_116 = arith.constant 0 : index
    %c0_117 = arith.constant 0 : index
    %158 = vector.load %arg14[%c0_116, %c0_117] : memref<1x64xf32, #tpu.memory_space<vmem>>, vector<1x64xf32>
    %159 = vector.broadcast %158 : vector<1x64xf32> to vector<8x64xf32>
    %160 = arith.mulf %157, %159 : vector<8x64xf32>
    %c0_118 = arith.constant 0 : index
    %c0_119 = arith.constant 0 : index
    %161 = vector.load %arg15[%c0_118, %c0_119] : memref<1x64xf32, #tpu.memory_space<vmem>>, vector<1x64xf32>
    %162 = vector.broadcast %161 : vector<1x64xf32> to vector<8x64xf32>
    %163 = arith.addf %160, %162 : vector<8x64xf32>
    %cst_120 = arith.constant 0.000000e+00 : f32
    %164 = vector.broadcast %cst_120 : f32 to vector<8x64xf32>
    %165 = arith.maximumf %163, %164 : vector<8x64xf32>
    %cst_121 = arith.constant 0.000000e+00 : f32
    %166 = vector.broadcast %cst_121 : f32 to vector<4x32xf32>
    %c0_122 = arith.constant 0 : index
    %c0_123 = arith.constant 0 : index
    %c0_124 = arith.constant 0 : index
    %167 = vector.load %arg16[%c0_122, %c0_123, %c0_124] : memref<3x4x8xf32, #tpu.memory_space<vmem>>, vector<1x4x8xf32>
    %168 = vector.shape_cast %167 : vector<1x4x8xf32> to vector<4x8xf32>
    %cst_125 = arith.constant dense<0.000000e+00> : vector<4x64xf32>
    %169 = tpu.matmul %168, %165, %cst_125 {dimension_numbers = #tpu.dot_dimension_numbers<[1], [0], [0], [1], [0, 0, 1, 1], [], []>} : vector<4x8xf32>, vector<8x64xf32>, vector<4x64xf32> -> vector<4x64xf32>
    %170 = arith.truncf %169 : vector<4x64xf32> to vector<4x64xbf16>
    %c0_126 = arith.constant 0 : index
    %c0_127 = arith.constant 0 : index
    %c0_128 = arith.constant 0 : index
    %171 = vector.load %arg17[%c0_126, %c0_127, %c0_128] : memref<3x64x32xbf16, #tpu.memory_space<vmem>>, vector<1x64x32xbf16>
    %172 = vector.shape_cast %171 : vector<1x64x32xbf16> to vector<64x32xbf16>
    %cst_129 = arith.constant dense<0.000000e+00> : vector<4x32xf32>
    %173 = tpu.matmul %170, %172, %cst_129 {dimension_numbers = #tpu.dot_dimension_numbers<[1], [0], [0], [1], [0, 0, 1, 1], [], []>} : vector<4x64xbf16>, vector<64x32xbf16>, vector<4x32xf32> -> vector<4x32xf32>
    %174 = arith.addf %166, %173 : vector<4x32xf32>
    %c1_130 = arith.constant 1 : index
    %c0_131 = arith.constant 0 : index
    %c0_132 = arith.constant 0 : index
    %175 = vector.load %arg16[%c1_130, %c0_131, %c0_132] : memref<3x4x8xf32, #tpu.memory_space<vmem>>, vector<1x4x8xf32>
    %176 = vector.shape_cast %175 : vector<1x4x8xf32> to vector<4x8xf32>
    %cst_133 = arith.constant dense<0.000000e+00> : vector<4x64xf32>
    %177 = tpu.matmul %176, %165, %cst_133 {dimension_numbers = #tpu.dot_dimension_numbers<[1], [0], [0], [1], [0, 0, 1, 1], [], []>} : vector<4x8xf32>, vector<8x64xf32>, vector<4x64xf32> -> vector<4x64xf32>
    %178 = arith.truncf %177 : vector<4x64xf32> to vector<4x64xbf16>
    %c1_134 = arith.constant 1 : index
    %c0_135 = arith.constant 0 : index
    %c0_136 = arith.constant 0 : index
    %179 = vector.load %arg17[%c1_134, %c0_135, %c0_136] : memref<3x64x32xbf16, #tpu.memory_space<vmem>>, vector<1x64x32xbf16>
    %180 = vector.shape_cast %179 : vector<1x64x32xbf16> to vector<64x32xbf16>
    %cst_137 = arith.constant dense<0.000000e+00> : vector<4x32xf32>
    %181 = tpu.matmul %178, %180, %cst_137 {dimension_numbers = #tpu.dot_dimension_numbers<[1], [0], [0], [1], [0, 0, 1, 1], [], []>} : vector<4x64xbf16>, vector<64x32xbf16>, vector<4x32xf32> -> vector<4x32xf32>
    %182 = arith.addf %174, %181 : vector<4x32xf32>
    %c2_138 = arith.constant 2 : index
    %c0_139 = arith.constant 0 : index
    %c0_140 = arith.constant 0 : index
    %183 = vector.load %arg16[%c2_138, %c0_139, %c0_140] : memref<3x4x8xf32, #tpu.memory_space<vmem>>, vector<1x4x8xf32>
    %184 = vector.shape_cast %183 : vector<1x4x8xf32> to vector<4x8xf32>
    %cst_141 = arith.constant dense<0.000000e+00> : vector<4x64xf32>
    %185 = tpu.matmul %184, %165, %cst_141 {dimension_numbers = #tpu.dot_dimension_numbers<[1], [0], [0], [1], [0, 0, 1, 1], [], []>} : vector<4x8xf32>, vector<8x64xf32>, vector<4x64xf32> -> vector<4x64xf32>
    %186 = arith.truncf %185 : vector<4x64xf32> to vector<4x64xbf16>
    %c2_142 = arith.constant 2 : index
    %c0_143 = arith.constant 0 : index
    %c0_144 = arith.constant 0 : index
    %187 = vector.load %arg17[%c2_142, %c0_143, %c0_144] : memref<3x64x32xbf16, #tpu.memory_space<vmem>>, vector<1x64x32xbf16>
    %188 = vector.shape_cast %187 : vector<1x64x32xbf16> to vector<64x32xbf16>
    %cst_145 = arith.constant dense<0.000000e+00> : vector<4x32xf32>
    %189 = tpu.matmul %186, %188, %cst_145 {dimension_numbers = #tpu.dot_dimension_numbers<[1], [0], [0], [1], [0, 0, 1, 1], [], []>} : vector<4x64xbf16>, vector<64x32xbf16>, vector<4x32xf32> -> vector<4x32xf32>
    %190 = arith.addf %182, %189 : vector<4x32xf32>
    %cst_146 = arith.constant dense<0.000000e+00> : vector<32xf32>
    %191 = vector.multi_reduction <add>, %190, %cst_146 [0] : vector<4x32xf32> to vector<32xf32>
    %192 = vector.shape_cast %191 : vector<32xf32> to vector<1x32xf32>
    %cst_147 = arith.constant 4.000000e+00 : f32
    %193 = vector.broadcast %cst_147 : f32 to vector<1x32xf32>
    %194 = arith.divf %192, %193 : vector<1x32xf32>
    %195 = arith.mulf %190, %190 : vector<4x32xf32>
    %cst_148 = arith.constant dense<0.000000e+00> : vector<32xf32>
    %196 = vector.multi_reduction <add>, %195, %cst_148 [0] : vector<4x32xf32> to vector<32xf32>
    %197 = vector.shape_cast %196 : vector<32xf32> to vector<1x32xf32>
    %cst_149 = arith.constant 4.000000e+00 : f32
    %198 = vector.broadcast %cst_149 : f32 to vector<1x32xf32>
    %199 = arith.divf %197, %198 : vector<1x32xf32>
    %c0_150 = arith.constant 0 : index
    %c0_151 = arith.constant 0 : index
    %200 = vector.load %arg18[%c0_150, %c0_151] : memref<32x32xf32, #tpu.memory_space<vmem>>, vector<32x32xf32>
    %cst_152 = arith.constant dense<0.000000e+00> : vector<1x32xf32>
    %201 = tpu.matmul %194, %200, %cst_152 {dimension_numbers = #tpu.dot_dimension_numbers<[1], [0], [0], [1], [0, 0, 1, 1], [], []>} : vector<1x32xf32>, vector<32x32xf32>, vector<1x32xf32> -> vector<1x32xf32>
    %c0_153 = arith.constant 0 : index
    %c0_154 = arith.constant 0 : index
    %202 = vector.load %arg18[%c0_153, %c0_154] : memref<32x32xf32, #tpu.memory_space<vmem>>, vector<32x32xf32>
    %cst_155 = arith.constant dense<0.000000e+00> : vector<1x32xf32>
    %203 = tpu.matmul %199, %202, %cst_155 {dimension_numbers = #tpu.dot_dimension_numbers<[1], [0], [0], [1], [0, 0, 1, 1], [], []>} : vector<1x32xf32>, vector<32x32xf32>, vector<1x32xf32> -> vector<1x32xf32>
    %204 = arith.mulf %201, %201 : vector<1x32xf32>
    %205 = arith.subf %203, %204 : vector<1x32xf32>
    %206 = vector.broadcast %201 : vector<1x32xf32> to vector<4x32xf32>
    %207 = arith.subf %190, %206 : vector<4x32xf32>
    %cst_156 = arith.constant 9.99999974E-6 : f32
    %208 = vector.broadcast %cst_156 : f32 to vector<1x32xf32>
    %209 = arith.addf %205, %208 : vector<1x32xf32>
    %210 = math.rsqrt %209 : vector<1x32xf32>
    %211 = vector.broadcast %210 : vector<1x32xf32> to vector<4x32xf32>
    %212 = arith.mulf %207, %211 : vector<4x32xf32>
    %c0_157 = arith.constant 0 : index
    %c0_158 = arith.constant 0 : index
    %213 = vector.load %arg19[%c0_157, %c0_158] : memref<1x32xf32, #tpu.memory_space<vmem>>, vector<1x32xf32>
    %214 = vector.broadcast %213 : vector<1x32xf32> to vector<4x32xf32>
    %215 = arith.mulf %212, %214 : vector<4x32xf32>
    %c0_159 = arith.constant 0 : index
    %c0_160 = arith.constant 0 : index
    %216 = vector.load %arg20[%c0_159, %c0_160] : memref<1x32xf32, #tpu.memory_space<vmem>>, vector<1x32xf32>
    %217 = vector.broadcast %216 : vector<1x32xf32> to vector<4x32xf32>
    %218 = arith.addf %215, %217 : vector<4x32xf32>
    %cst_161 = arith.constant 0.000000e+00 : f32
    %219 = vector.broadcast %cst_161 : f32 to vector<4x32xf32>
    %220 = arith.maximumf %218, %219 : vector<4x32xf32>
    %221 = arith.truncf %220 : vector<4x32xf32> to vector<4x32xbf16>
    %c0_162 = arith.constant 0 : index
    %c0_163 = arith.constant 0 : index
    %c0_164 = arith.constant 0 : index
    %222 = vector.load %arg21[%c0_162, %c0_163, %c0_164] : memref<3x32x32xbf16, #tpu.memory_space<vmem>>, vector<1x32x32xbf16>
    %223 = vector.shape_cast %222 : vector<1x32x32xbf16> to vector<32x32xbf16>
    %cst_165 = arith.constant dense<0.000000e+00> : vector<4x32xf32>
    %224 = tpu.matmul %221, %223, %cst_165 {dimension_numbers = #tpu.dot_dimension_numbers<[1], [0], [0], [1], [0, 0, 1, 1], [], []>} : vector<4x32xbf16>, vector<32x32xbf16>, vector<4x32xf32> -> vector<4x32xf32>
    %c0_166 = arith.constant 0 : index
    %c0_167 = arith.constant 0 : index
    %c0_168 = arith.constant 0 : index
    %225 = vector.load %arg22[%c0_166, %c0_167, %c0_168] : memref<3x1x32xf32, #tpu.memory_space<vmem>>, vector<1x1x32xf32>
    %226 = vector.shape_cast %225 : vector<1x1x32xf32> to vector<1x32xf32>
    %227 = vector.broadcast %226 : vector<1x32xf32> to vector<4x32xf32>
    %228 = arith.addf %224, %227 : vector<4x32xf32>
    %c0_169 = arith.constant 0 : index
    %c0_170 = arith.constant 0 : index
    %229 = vector.load %arg26[%c0_169, %c0_170] : memref<4x32xf32, #tpu.memory_space<vmem>>, vector<4x32xf32>
    tpu.vector_store %arg26[%c0_169, %c0_170], %228 {strides = array<i32>} : memref<4x32xf32, #tpu.memory_space<vmem>>, vector<4x32xf32>,
    %c1_171 = arith.constant 1 : index
    %c0_172 = arith.constant 0 : index
    %c0_173 = arith.constant 0 : index
    %230 = vector.load %arg21[%c1_171, %c0_172, %c0_173] : memref<3x32x32xbf16, #tpu.memory_space<vmem>>, vector<1x32x32xbf16>
    %231 = vector.shape_cast %230 : vector<1x32x32xbf16> to vector<32x32xbf16>
    %cst_174 = arith.constant dense<0.000000e+00> : vector<4x32xf32>
    %232 = tpu.matmul %221, %231, %cst_174 {dimension_numbers = #tpu.dot_dimension_numbers<[1], [0], [0], [1], [0, 0, 1, 1], [], []>} : vector<4x32xbf16>, vector<32x32xbf16>, vector<4x32xf32> -> vector<4x32xf32>
    %c1_175 = arith.constant 1 : index
    %c0_176 = arith.constant 0 : index
    %c0_177 = arith.constant 0 : index
    %233 = vector.load %arg22[%c1_175, %c0_176, %c0_177] : memref<3x1x32xf32, #tpu.memory_space<vmem>>, vector<1x1x32xf32>
    %234 = vector.shape_cast %233 : vector<1x1x32xf32> to vector<1x32xf32>
    %235 = vector.broadcast %234 : vector<1x32xf32> to vector<4x32xf32>
    %236 = arith.addf %232, %235 : vector<4x32xf32>
    %c0_178 = arith.constant 0 : index
    %c0_179 = arith.constant 0 : index
    %237 = vector.load %arg27[%c0_178, %c0_179] : memref<4x32xf32, #tpu.memory_space<vmem>>, vector<4x32xf32>
    tpu.vector_store %arg27[%c0_178, %c0_179], %236 {strides = array<i32>} : memref<4x32xf32, #tpu.memory_space<vmem>>, vector<4x32xf32>,
    %c2_180 = arith.constant 2 : index
    %c0_181 = arith.constant 0 : index
    %c0_182 = arith.constant 0 : index
    %238 = vector.load %arg21[%c2_180, %c0_181, %c0_182] : memref<3x32x32xbf16, #tpu.memory_space<vmem>>, vector<1x32x32xbf16>
    %239 = vector.shape_cast %238 : vector<1x32x32xbf16> to vector<32x32xbf16>
    %cst_183 = arith.constant dense<0.000000e+00> : vector<4x32xf32>
    %240 = tpu.matmul %221, %239, %cst_183 {dimension_numbers = #tpu.dot_dimension_numbers<[1], [0], [0], [1], [0, 0, 1, 1], [], []>} : vector<4x32xbf16>, vector<32x32xbf16>, vector<4x32xf32> -> vector<4x32xf32>
    %c2_184 = arith.constant 2 : index
    %c0_185 = arith.constant 0 : index
    %c0_186 = arith.constant 0 : index
    %241 = vector.load %arg22[%c2_184, %c0_185, %c0_186] : memref<3x1x32xf32, #tpu.memory_space<vmem>>, vector<1x1x32xf32>
    %242 = vector.shape_cast %241 : vector<1x1x32xf32> to vector<1x32xf32>
    %243 = vector.broadcast %242 : vector<1x32xf32> to vector<4x32xf32>
    %244 = arith.addf %240, %243 : vector<4x32xf32>
    %c0_187 = arith.constant 0 : index
    %c0_188 = arith.constant 0 : index
    %245 = vector.load %arg28[%c0_187, %c0_188] : memref<4x32xf32, #tpu.memory_space<vmem>>, vector<4x32xf32>
    tpu.vector_store %arg28[%c0_187, %c0_188], %244 {strides = array<i32>} : memref<4x32xf32, #tpu.memory_space<vmem>>, vector<4x32xf32>,
    %c0_189 = arith.constant 0 : index
    %c0_190 = arith.constant 0 : index
    %c0_191 = arith.constant 0 : index
    %246 = vector.load %arg23[%c0_189, %c0_190, %c0_191] : memref<3x32x32xf32, #tpu.memory_space<vmem>>, vector<1x32x32xf32>
    %247 = vector.shape_cast %246 : vector<1x32x32xf32> to vector<32x32xf32>
    %c1_192 = arith.constant 1 : index
    %c0_193 = arith.constant 0 : index
    %c0_194 = arith.constant 0 : index
    %248 = vector.load %arg23[%c1_192, %c0_193, %c0_194] : memref<3x32x32xf32, #tpu.memory_space<vmem>>, vector<1x32x32xf32>
    %249 = vector.shape_cast %248 : vector<1x32x32xf32> to vector<32x32xf32>
    %c2_195 = arith.constant 2 : index
    %c0_196 = arith.constant 0 : index
    %c0_197 = arith.constant 0 : index
    %250 = vector.load %arg23[%c2_195, %c0_196, %c0_197] : memref<3x32x32xf32, #tpu.memory_space<vmem>>, vector<1x32x32xf32>
    %251 = vector.shape_cast %250 : vector<1x32x32xf32> to vector<32x32xf32>
    %c0_198 = arith.constant 0 : index
    %c0_199 = arith.constant 0 : index
    %c0_200 = arith.constant 0 : index
    %252 = vector.load %arg24[%c0_198, %c0_199, %c0_200] : memref<3x1x32xf32, #tpu.memory_space<vmem>>, vector<1x1x32xf32>
    %253 = vector.shape_cast %252 : vector<1x1x32xf32> to vector<1x32xf32>
    %c1_201 = arith.constant 1 : index
    %c0_202 = arith.constant 0 : index
    %c0_203 = arith.constant 0 : index
    %254 = vector.load %arg24[%c1_201, %c0_202, %c0_203] : memref<3x1x32xf32, #tpu.memory_space<vmem>>, vector<1x1x32xf32>
    %255 = vector.shape_cast %254 : vector<1x1x32xf32> to vector<1x32xf32>
    %c2_204 = arith.constant 2 : index
    %c0_205 = arith.constant 0 : index
    %c0_206 = arith.constant 0 : index
    %256 = vector.load %arg24[%c2_204, %c0_205, %c0_206] : memref<3x1x32xf32, #tpu.memory_space<vmem>>, vector<1x1x32xf32>
    %257 = vector.shape_cast %256 : vector<1x1x32xf32> to vector<1x32xf32>
    %cst_207 = arith.constant 0.000000e+00 : f32
    %258 = vector.broadcast %cst_207 : f32 to vector<2x32xf32>
    %c0_i32 = arith.constant 0 : i32
    %c2_i32 = arith.constant 2 : i32
    %259 = arith.muli %c0_i32, %c2_i32 : i32
    %260 = arith.index_cast %259 : i32 to index
    %c0_208 = arith.constant 0 : index
    %261 = vector.load %arg26[%260, %c0_208] : memref<4x32xf32, #tpu.memory_space<vmem>>, vector<2x32xf32>
    %c2_i32_209 = arith.constant 2 : i32
    %262 = arith.muli %c0_i32, %c2_i32_209 : i32
    %263 = arith.index_cast %262 : i32 to index
    %c0_210 = arith.constant 0 : index
    %264 = vector.load %arg27[%263, %c0_210] : memref<4x32xf32, #tpu.memory_space<vmem>>, vector<2x32xf32>
    %c2_i32_211 = arith.constant 2 : i32
    %265 = arith.muli %c0_i32, %c2_i32_211 : i32
    %266 = arith.index_cast %265 : i32 to index
    %c0_212 = arith.constant 0 : index
    %267 = vector.load %arg28[%266, %c0_212] : memref<4x32xf32, #tpu.memory_space<vmem>>, vector<2x32xf32>
    %cst_213 = arith.constant dense<0.000000e+00> : vector<2x32xf32>
    %268 = tpu.matmul %258, %247, %cst_213 {dimension_numbers = #tpu.dot_dimension_numbers<[1], [0], [0], [1], [0, 0, 1, 1], [], []>} : vector<2x32xf32>, vector<32x32xf32>, vector<2x32xf32> -> vector<2x32xf32>
    %269 = vector.broadcast %253 : vector<1x32xf32> to vector<2x32xf32>
    %270 = arith.addf %268, %269 : vector<2x32xf32>
    %cst_214 = arith.constant dense<0.000000e+00> : vector<2x32xf32>
    %271 = tpu.matmul %258, %249, %cst_214 {dimension_numbers = #tpu.dot_dimension_numbers<[1], [0], [0], [1], [0, 0, 1, 1], [], []>} : vector<2x32xf32>, vector<32x32xf32>, vector<2x32xf32> -> vector<2x32xf32>
    %272 = vector.broadcast %255 : vector<1x32xf32> to vector<2x32xf32>
    %273 = arith.addf %271, %272 : vector<2x32xf32>
    %cst_215 = arith.constant dense<0.000000e+00> : vector<2x32xf32>
    %274 = tpu.matmul %258, %251, %cst_215 {dimension_numbers = #tpu.dot_dimension_numbers<[1], [0], [0], [1], [0, 0, 1, 1], [], []>} : vector<2x32xf32>, vector<32x32xf32>, vector<2x32xf32> -> vector<2x32xf32>
    %275 = vector.broadcast %257 : vector<1x32xf32> to vector<2x32xf32>
    %276 = arith.addf %274, %275 : vector<2x32xf32>
    %277 = arith.addf %261, %270 : vector<2x32xf32>
    %278 = arith.negf %277 : vector<2x32xf32>
    %279 = math.exp %278 : vector<2x32xf32>
    %cst_216 = arith.constant 1.000000e+00 : f32
    %280 = vector.broadcast %cst_216 : f32 to vector<2x32xf32>
    %281 = arith.addf %280, %279 : vector<2x32xf32>
    %282 = arith.divf %280, %281 : vector<2x32xf32>
    %283 = arith.addf %264, %273 : vector<2x32xf32>
    %284 = arith.negf %283 : vector<2x32xf32>
    %285 = math.exp %284 : vector<2x32xf32>
    %cst_217 = arith.constant 1.000000e+00 : f32
    %286 = vector.broadcast %cst_217 : f32 to vector<2x32xf32>
    %287 = arith.addf %286, %285 : vector<2x32xf32>
    %288 = arith.divf %286, %287 : vector<2x32xf32>
    %289 = arith.mulf %282, %276 : vector<2x32xf32>
    %290 = arith.addf %267, %289 : vector<2x32xf32>
    %291 = math.tanh %290 : vector<2x32xf32>
    %cst_218 = arith.constant 1.000000e+00 : f32
    %292 = vector.broadcast %cst_218 : f32 to vector<2x32xf32>
    %293 = arith.subf %292, %288 : vector<2x32xf32>
    %294 = arith.mulf %293, %291 : vector<2x32xf32>
    %295 = arith.mulf %288, %258 : vector<2x32xf32>
    %296 = arith.addf %294, %295 : vector<2x32xf32>
    %c1_i32 = arith.constant 1 : i32
    %c2_i32_219 = arith.constant 2 : i32
    %297 = arith.muli %c1_i32, %c2_i32_219 : i32
    %298 = arith.index_cast %297 : i32 to index
    %c0_220 = arith.constant 0 : index
    %299 = vector.load %arg26[%298, %c0_220] : memref<4x32xf32, #tpu.memory_space<vmem>>, vector<2x32xf32>
    %c2_i32_221 = arith.constant 2 : i32
    %300 = arith.muli %c1_i32, %c2_i32_221 : i32
    %301 = arith.index_cast %300 : i32 to index
    %c0_222 = arith.constant 0 : index
    %302 = vector.load %arg27[%301, %c0_222] : memref<4x32xf32, #tpu.memory_space<vmem>>, vector<2x32xf32>
    %c2_i32_223 = arith.constant 2 : i32
    %303 = arith.muli %c1_i32, %c2_i32_223 : i32
    %304 = arith.index_cast %303 : i32 to index
    %c0_224 = arith.constant 0 : index
    %305 = vector.load %arg28[%304, %c0_224] : memref<4x32xf32, #tpu.memory_space<vmem>>, vector<2x32xf32>
    %cst_225 = arith.constant dense<0.000000e+00> : vector<2x32xf32>
    %306 = tpu.matmul %296, %247, %cst_225 {dimension_numbers = #tpu.dot_dimension_numbers<[1], [0], [0], [1], [0, 0, 1, 1], [], []>} : vector<2x32xf32>, vector<32x32xf32>, vector<2x32xf32> -> vector<2x32xf32>
    %307 = vector.broadcast %253 : vector<1x32xf32> to vector<2x32xf32>
    %308 = arith.addf %306, %307 : vector<2x32xf32>
    %cst_226 = arith.constant dense<0.000000e+00> : vector<2x32xf32>
    %309 = tpu.matmul %296, %249, %cst_226 {dimension_numbers = #tpu.dot_dimension_numbers<[1], [0], [0], [1], [0, 0, 1, 1], [], []>} : vector<2x32xf32>, vector<32x32xf32>, vector<2x32xf32> -> vector<2x32xf32>
    %310 = vector.broadcast %255 : vector<1x32xf32> to vector<2x32xf32>
    %311 = arith.addf %309, %310 : vector<2x32xf32>
    %cst_227 = arith.constant dense<0.000000e+00> : vector<2x32xf32>
    %312 = tpu.matmul %296, %251, %cst_227 {dimension_numbers = #tpu.dot_dimension_numbers<[1], [0], [0], [1], [0, 0, 1, 1], [], []>} : vector<2x32xf32>, vector<32x32xf32>, vector<2x32xf32> -> vector<2x32xf32>
    %313 = vector.broadcast %257 : vector<1x32xf32> to vector<2x32xf32>
    %314 = arith.addf %312, %313 : vector<2x32xf32>
    %315 = arith.addf %299, %308 : vector<2x32xf32>
    %316 = arith.negf %315 : vector<2x32xf32>
    %317 = math.exp %316 : vector<2x32xf32>
    %cst_228 = arith.constant 1.000000e+00 : f32
    %318 = vector.broadcast %cst_228 : f32 to vector<2x32xf32>
    %319 = arith.addf %318, %317 : vector<2x32xf32>
    %320 = arith.divf %318, %319 : vector<2x32xf32>
    %321 = arith.addf %302, %311 : vector<2x32xf32>
    %322 = arith.negf %321 : vector<2x32xf32>
    %323 = math.exp %322 : vector<2x32xf32>
    %cst_229 = arith.constant 1.000000e+00 : f32
    %324 = vector.broadcast %cst_229 : f32 to vector<2x32xf32>
    %325 = arith.addf %324, %323 : vector<2x32xf32>
    %326 = arith.divf %324, %325 : vector<2x32xf32>
    %327 = arith.mulf %320, %314 : vector<2x32xf32>
    %328 = arith.addf %305, %327 : vector<2x32xf32>
    %329 = math.tanh %328 : vector<2x32xf32>
    %cst_230 = arith.constant 1.000000e+00 : f32
    %330 = vector.broadcast %cst_230 : f32 to vector<2x32xf32>
    %331 = arith.subf %330, %326 : vector<2x32xf32>
    %332 = arith.mulf %331, %329 : vector<2x32xf32>
    %333 = arith.mulf %326, %296 : vector<2x32xf32>
    %334 = arith.addf %332, %333 : vector<2x32xf32>
    %c2_i32_231 = arith.constant 2 : i32
    %c0_232 = arith.constant 0 : index
    %c0_233 = arith.constant 0 : index
    %335 = vector.load %arg25[%c0_232, %c0_233] : memref<2x32xf32, #tpu.memory_space<vmem>>, vector<2x32xf32>
    tpu.vector_store %arg25[%c0_232, %c0_233], %334 {strides = array<i32>} : memref<2x32xf32, #tpu.memory_space<vmem>>, vector<2x32xf32>,
    return
  }
}

</mosaic_0001>

<bundles_post_ra>
// kernel: reference_encoder_forward.1
= control target key start
LH: loop header
LB: loop body
LE: loop exit
PB: predicated region body
PF: predicated region fallthrough
CT: control target
= control target key end

     0   :  { %s6543_s0 = inlined_call_operand.vmem [shape: f32[64,32], index: 0, kind: input, shape index: {}]   ;;  %s6544_s1 = inlined_call_operand.vmem [shape: f32[3,32,64], index: 1, kind: input, shape index: {}]   ;;  %s6545_s2 = inlined_call_operand.hbm [shape: bf16[3,32,128], index: 2, kind: input, shape index: {}]   ;;  %s6546_s3 = inlined_call_operand.vmem [shape: f32[128,128], index: 3, kind: input, shape index: {}]   ;;  %s6547_s4 = inlined_call_operand.hbm [shape: f32[1,128], index: 4, kind: input, shape index: {}]   ;;  %s6548_s5 = inlined_call_operand.hbm [shape: f32[1,128], index: 5, kind: input, shape index: {}]   ;;  %s6549_s6 = inlined_call_operand.hbm [shape: f32[3,16,32], index: 6, kind: input, shape index: {}]   ;;  %s6550_s7 = inlined_call_operand.vmem [shape: bf16[3,128,64], index: 7, kind: input, shape index: {}]   ;;  %s6551_s8 = inlined_call_operand.vmem [shape: f32[64,64], index: 8, kind: input, shape index: {}]   ;;  %s6552_s9 = inlined_call_operand.hbm [shape: f32[1,64], index: 9, kind: input, shape index: {}]   ;;  %s6553_s10 = inlined_call_operand.hbm [shape: f32[1,64], index: 10, kind: input, shape index: {}]   ;;  %s6554_s11 = inlined_call_operand.vmem [shape: f32[3,8,16], index: 11, kind: input, shape index: {}]   ;;  %s6555_s12 = inlined_call_operand.vmem [shape: bf16[3,64,64], index: 12, kind: input, shape index: {}]   ;;  %s6556_s13 = inlined_call_operand.hbm [shape: f32[64,64], index: 13, kind: input, shape index: {}]   ;;  %s6557_s14 = inlined_call_operand.hbm [shape: f32[1,64], index: 14, kind: input, shape index: {}]   ;;  %s6558_s15 = inlined_call_operand.hbm [shape: f32[1,64], index: 15, kind: input, shape index: {}]   ;;  %s6559_s16 = inlined_call_operand.hbm [shape: f32[3,4,8], index: 16, kind: input, shape index: {}]   ;;  %s6560_s17 = inlined_call_operand.vmem [shape: bf16[3,64,32], index: 17, kind: input, shape index: {}]   ;;  %s6561_s18 = inlined_call_operand.hbm [shape: f32[32,32], index: 18, kind: input, shape index: {}]   ;;  %s6562_s19 = inlined_call_operand.hbm [shape: f32[1,32], index: 19, kind: input, shape index: {}]   ;;  %s6563_s20 = inlined_call_operand.hbm [shape: f32[1,32], index: 20, kind: input, shape index: {}]   ;;  %s6564_s21 = inlined_call_operand.vmem [shape: bf16[3,32,32], index: 21, kind: input, shape index: {}]   ;;  %s6565_s22 = inlined_call_operand.vmem [shape: f32[3,1,32], index: 22, kind: input, shape index: {}]   ;;  %s6566_s23 = inlined_call_operand.vmem [shape: f32[3,32,32], index: 23, kind: input, shape index: {}]   ;;  %s6567_s24 = inlined_call_operand.vmem [shape: f32[3,1,32], index: 24, kind: input, shape index: {}]   ;;  %s6568_s25 = inlined_call_operand.hbm [shape: f32[2,32], index: 25, kind: output, shape index: {}]  }
   0x1   :  { %6581 = sst [smem:[#allocation35_spill]] %s6543_s0 }
   0x2   :  { %6582 = sst [smem:[#allocation36_spill]] %s6544_s1 }
   0x3   :  { %6583 = sst [smem:[#allocation37_spill]] %s6545_s2 }
   0x4   :  { %6584 = sst [smem:[#allocation38_spill]] %s6546_s3 }
   0x5   :  { %6585 = sst [smem:[#allocation39_spill]] %s6547_s4 }
   0x6   :  { %6586 = sst [smem:[#allocation40_spill]] %s6548_s5 }
   0x7   :  { %6587 = sst [smem:[#allocation41_spill]] %s6549_s6 }
   0x8   :  { %6588 = sst [smem:[#allocation42_spill]] %s6550_s7 }
   0x9   :  { %6589 = sst [smem:[#allocation43_spill]] %s6551_s8 }
   0xa   :  { %6590 = sst [smem:[#allocation44_spill]] %s6552_s9 }
   0xb   :  { %6591 = sst [smem:[#allocation45_spill]] %s6567_s24 }
   0xc   :  { %6592 = sst [smem:[#allocation46_spill]] %s6568_s25 }
   0xd   :  { %30 = vsyncpa [#allocation6], 0 }
   0xe   :  { %31 = vsyncpa [#allocation9], 0 }
   0xf   :  { %32 = vsyncpa [#allocation12], 0 }
  0x10   :  { %33 = vsyncpa [#allocation15], 0 }
  0x11   :  { %34 = vsyncpa [#allocation18], 0 }
  0x12   :  { %35 = vsyncpa [#allocation21], 0 }
  0x13   :  { %36 = vsyncpa [#allocation24], 0 }
  0x14   :  { %37 = vsyncpa [#allocation7], 0  ;;  %s5560_s29 = smov [#allocation8]   ;;  %s5561_s6 = smov [#allocation11]  }
  0x15   :  { %s62_s2 = sshll.u32 %s5560_s29, 4  ;;  %s81_s30 = sshll.u32 %s5561_s6, 4  ;;  %s63_s2 = int_to_ptr.vmem [resolvable:$true] %s62_s2  ;;  %s5711_s30 = int_to_ptr.vmem [resolvable:$true] %s81_s30 }
  0x16   :  { %s6593_s26 = sld [smem:[#allocation39_spill]] }
  0x1c   :  { %s5236_s1 = scalar_lea.hbm %s6593_s26, 16 }
  0x1d   :  { %p5237_p0 = scmp.ne.s32.totalorder %s6593_s26, %s5236_s1  ;;  %p5240_p1 = scmp.lt.u32.totalorder %s5236_s1, %s6593_s26 }
  0x1f   :  { %p5242_p2 = pnand %p5240_p1, %p5237_p0 }
  0x21   :  { %5245 = shalt.err (!%p5242_p2)
}
  0x22   :  { %s5246_s9 = scalar_lea.vmem %s63_s2, 16  ;;  %s5250_s5 = scalar_lea.vmem %s63_s2, 32 }
  0x23   :  { %p5247_p3 = scmp.ne.s32.totalorder %s63_s2, %s5246_s9  ;;  %p5251_p4 = scmp.lt.s32.totalorder %s63_s2, %s63_s2 }
  0x24   :  { %p5252_p5 = scmp.lt.s32.totalorder %s5250_s5, %s5246_s9 }
  0x26   :  { %p5253_p6 = por %p5252_p5, %p5251_p4 }
  0x28   :  { %p5254_p7 = pnand %p5253_p6, %p5247_p3 }
  0x2a   :  { %5257 = shalt.err (!%p5254_p7)
}
  0x2b   :  { %65 = dma.hbm_to_vmem [thread:$0]  %s6593_s26, 16, %s63_s2, [#allocation9]  }
  0x2c   :  { %s6594_s3 = sld [smem:[#allocation41_spill]] }
  0x32   :  { %s5258_s8 = scalar_lea.hbm %s6594_s3, 768 }
  0x33   :  { %p5259_p8 = scmp.ne.s32.totalorder %s6594_s3, %s5258_s8  ;;  %p5262_p9 = scmp.lt.u32.totalorder %s5258_s8, %s6594_s3 }
  0x35   :  { %p5264_p10 = pnand %p5262_p9, %p5259_p8 }
  0x37   :  { %5267 = shalt.err (!%p5264_p10)
}
  0x38   :  { %s5268_s9 = scalar_lea.vmem %s5711_s30, 768  ;;  %p5273_p12 = scmp.lt.s32.totalorder %s5711_s30, %s5711_s30 }
  0x39   :  { %p5269_p11 = scmp.ne.s32.totalorder %s5711_s30, %s5268_s9  ;;  %p5274_p13 = scmp.lt.s32.totalorder %s5268_s9, %s5268_s9 }
  0x3b   :  { %p5275_p0 = por %p5274_p13, %p5273_p12 }
  0x3d   :  { %p5276_p1 = pnand %p5275_p0, %p5269_p11 }
  0x3f   :  { %5279 = shalt.err (!%p5276_p1)
}
  0x40   :  { %s5562_s2 = smov 128   ;;  %s5563_s26 = smov 8  }
  0x41   :  { %87 = dma.hbm_to_vmem [thread:$0]  %s6594_s3, 768, %s5711_s30, [#allocation12], %s5562_s2, %s5562_s2, %s5563_s26  }
  0x42   :  { %s5564_s29 = smov [#allocation14]   ;;  %s5565_s7 = smov [#allocation17]  }
  0x43   :  { %s108_s6 = sshll.u32 %s5564_s29, 4  ;;  %s134_s8 = sshll.u32 %s5565_s7, 4  ;;  %s109_s6 = int_to_ptr.vmem [resolvable:$true] %s108_s6  ;;  %s135_s8 = int_to_ptr.vmem [resolvable:$true] %s134_s8 }
  0x44   :  { %s5280_s4 = scalar_lea.hbm %s6553_s10, 16 }
  0x45   :  { %p5281_p2 = scmp.ne.s32.totalorder %s6553_s10, %s5280_s4  ;;  %p5284_p3 = scmp.lt.u32.totalorder %s5280_s4, %s6553_s10 }
  0x47   :  { %p5286_p4 = pnand %p5284_p3, %p5281_p2 }
  0x49   :  { %5289 = shalt.err (!%p5286_p4)
}
  0x4a   :  { %s5290_s30 = scalar_lea.vmem %s109_s6, 16  ;;  %s5294_s3 = scalar_lea.vmem %s109_s6, 32 }
  0x4b   :  { %p5291_p5 = scmp.ne.s32.totalorder %s109_s6, %s5290_s30  ;;  %p5295_p6 = scmp.lt.s32.totalorder %s109_s6, %s109_s6 }
  0x4c   :  { %p5296_p7 = scmp.lt.s32.totalorder %s5294_s3, %s5290_s30 }
  0x4e   :  { %p5297_p8 = por %p5296_p7, %p5295_p6 }
  0x50   :  { %p5298_p9 = pnand %p5297_p8, %p5291_p5 }
  0x52   :  { %5301 = shalt.err (!%p5298_p9)
}
  0x53   :  { %111 = dma.hbm_to_vmem [thread:$0]  %s6553_s10, 16, %s109_s6, [#allocation15]  }
  0x54   :  { %s5302_s27 = scalar_lea.hbm %s6557_s14, 16 }
  0x55   :  { %p5303_p10 = scmp.ne.s32.totalorder %s6557_s14, %s5302_s27  ;;  %p5306_p11 = scmp.lt.u32.totalorder %s5302_s27, %s6557_s14 }
  0x57   :  { %p5308_p12 = pnand %p5306_p11, %p5303_p10 }
  0x59   :  { %5311 = shalt.err (!%p5308_p12)
}
  0x5a   :  { %s5312_s28 = scalar_lea.vmem %s135_s8, 16  ;;  %s5316_s9 = scalar_lea.vmem %s135_s8, 32 }
  0x5b   :  { %p5313_p13 = scmp.ne.s32.totalorder %s135_s8, %s5312_s28  ;;  %p5317_p0 = scmp.lt.s32.totalorder %s135_s8, %s135_s8 }
  0x5c   :  { %p5318_p1 = scmp.lt.s32.totalorder %s5316_s9, %s5312_s28 }
  0x5e   :  { %p5319_p2 = por %p5318_p1, %p5317_p0 }
  0x60   :  { %p5320_p3 = pnand %p5319_p2, %p5313_p13 }
  0x62   :  { %5323 = shalt.err (!%p5320_p3)
}
  0x63   :  { %137 = dma.hbm_to_vmem [thread:$0]  %s6557_s14, 16, %s135_s8, [#allocation18]  }
  0x64   :  { %s5566_s30 = smov [#allocation20]   ;;  %s5567_s5 = smov [#allocation23]  }
  0x65   :  { %s153_s3 = sshll.u32 %s5566_s30, 4  ;;  %s180_s0 = sshll.u32 %s5567_s5, 4  ;;  %s154_s3 = int_to_ptr.vmem [resolvable:$true] %s153_s3  ;;  %s5769_s0 = int_to_ptr.vmem [resolvable:$true] %s180_s0 }
  0x66   :  { %s5324_s27 = scalar_lea.hbm %s6559_s16, 192 }
  0x67   :  { %p5325_p4 = scmp.ne.s32.totalorder %s6559_s16, %s5324_s27  ;;  %p5328_p5 = scmp.lt.u32.totalorder %s5324_s27, %s6559_s16 }
  0x69   :  { %p5330_p6 = pnand %p5328_p5, %p5325_p4 }
  0x6b   :  { %5333 = shalt.err (!%p5330_p6)
}
  0x6c   :  { %s5334_s14 = scalar_lea.vmem %s154_s3, 192  ;;  %p5339_p8 = scmp.lt.s32.totalorder %s154_s3, %s154_s3 }
  0x6d   :  { %p5335_p7 = scmp.ne.s32.totalorder %s154_s3, %s5334_s14  ;;  %p5340_p9 = scmp.lt.s32.totalorder %s5334_s14, %s5334_s14 }
  0x6f   :  { %p5341_p10 = por %p5340_p9, %p5339_p8 }
  0x71   :  { %p5342_p11 = pnand %p5341_p10, %p5335_p7 }
  0x73   :  { %5345 = shalt.err (!%p5342_p11)
}
  0x74   :  { %s5568_s8 = smov 64   ;;  %s5569_s28 = smov 4  }
  0x75   :  { %159 = dma.hbm_to_vmem [thread:$0]  %s6559_s16, 192, %s154_s3, [#allocation21], %s5568_s8, %s5568_s8, %s5569_s28  }
  0x76   :  { %s5346_s5 = scalar_lea.hbm %s6562_s19, 16 }
  0x77   :  { %p5347_p12 = scmp.ne.s32.totalorder %s6562_s19, %s5346_s5  ;;  %p5350_p13 = scmp.lt.u32.totalorder %s5346_s5, %s6562_s19 }
  0x79   :  { %p5352_p0 = pnand %p5350_p13, %p5347_p12 }
  0x7b   :  { %5355 = shalt.err (!%p5352_p0)
}
  0x7c   :  { %s5356_s25 = scalar_lea.vmem %s5769_s0, 16  ;;  %s5360_s16 = scalar_lea.vmem %s5769_s0, 32 }
  0x7d   :  { %p5357_p1 = scmp.ne.s32.totalorder %s5769_s0, %s5356_s25  ;;  %p5361_p2 = scmp.lt.s32.totalorder %s5769_s0, %s5769_s0 }
  0x7e   :  { %p5362_p3 = scmp.lt.s32.totalorder %s5360_s16, %s5356_s25 }
  0x80   :  { %p5363_p4 = por %p5362_p3, %p5361_p2 }
  0x82   :  { %p5364_p5 = pnand %p5363_p4, %p5357_p1 }
  0x84   :  { %5367 = shalt.err (!%p5364_p5)
}
  0x85   :  { %183 = dma.hbm_to_vmem [thread:$0]  %s6562_s19, 16, %s5769_s0, [#allocation24]  }
  0x86   :  { %s5570_s4 = smov [#allocation5]   ;;  %s5571_s9 = smov [#allocation10]  }
  0x87   :  { %s47_s14 = sshll.u32 %s5570_s4, 4  ;;  %s72_s10 = sshll.u32 %s5571_s9, 4  ;;  %s48_s14 = int_to_ptr.vmem [resolvable:$true] %s47_s14  ;;  %s73_s10 = int_to_ptr.vmem [resolvable:$true] %s72_s10 }
  0x88   :  { %s6595_s5 = sld [smem:[#allocation37_spill]] }
  0x8e   :  { %s5368_s29 = scalar_lea.hbm %s6595_s5, 768 }
  0x8f   :  { %p5369_p6 = scmp.ne.s32.totalorder %s6595_s5, %s5368_s29  ;;  %p5372_p7 = scmp.lt.u32.totalorder %s5368_s29, %s6595_s5 }
  0x91   :  { %p5374_p8 = pnand %p5372_p7, %p5369_p6 }
  0x93   :  { %5377 = shalt.err (!%p5374_p8)
}
  0x94   :  { %s5378_s19 = scalar_lea.vmem %s48_s14, 768  ;;  %p5383_p10 = scmp.lt.s32.totalorder %s48_s14, %s48_s14 }
  0x95   :  { %p5379_p9 = scmp.ne.s32.totalorder %s48_s14, %s5378_s19  ;;  %p5384_p11 = scmp.lt.s32.totalorder %s5378_s19, %s5378_s19 }
  0x97   :  { %p5385_p12 = por %p5384_p11, %p5383_p10 }
  0x99   :  { %p5386_p13 = pnand %p5385_p12, %p5379_p9 }
  0x9b   :  { %5389 = shalt.err (!%p5386_p13)
}
  0x9c   :  { %53 = dma.hbm_to_vmem [thread:$0]  %s6595_s5, 768, %s48_s14, [#allocation6], %s5568_s8, %s5568_s8, %s5569_s28  }
  0x9d   :  { %s6596_s4 = sld [smem:[#allocation40_spill]] }
  0xa3   :  { %s5390_s9 = scalar_lea.hbm %s6596_s4, 16 }
  0xa4   :  { %p5391_p0 = scmp.ne.s32.totalorder %s6596_s4, %s5390_s9  ;;  %p5394_p1 = scmp.lt.u32.totalorder %s5390_s9, %s6596_s4 }
  0xa6   :  { %p5396_p2 = pnand %p5394_p1, %p5391_p0 }
  0xa8   :  { %5399 = shalt.err (!%p5396_p2)
}
  0xa9   :  { %s5400_s27 = scalar_lea.vmem %s73_s10, 16  ;;  %s5404_s24 = scalar_lea.vmem %s73_s10, 32 }
  0xaa   :  { %p5401_p3 = scmp.ne.s32.totalorder %s73_s10, %s5400_s27  ;;  %p5405_p4 = scmp.lt.s32.totalorder %s73_s10, %s73_s10 }
  0xab   :  { %p5406_p5 = scmp.lt.s32.totalorder %s5404_s24, %s5400_s27 }
  0xad   :  { %p5407_p6 = por %p5406_p5, %p5405_p4 }
  0xaf   :  { %p5408_p7 = pnand %p5407_p6, %p5401_p3 }
  0xb1   :  { %5411 = shalt.err (!%p5408_p7)
}
  0xb2   :  { %75 = dma.hbm_to_vmem [thread:$0]  %s6596_s4, 16, %s73_s10, [#allocation9]  }
  0xb3   :  { %s5572_s14 = smov [#allocation13]   ;;  %s5573_s25 = smov [#allocation16]  }
  0xb4   :  { %s98_s5 = sshll.u32 %s5572_s14, 4  ;;  %s121_s19 = sshll.u32 %s5573_s25, 4  ;;  %s99_s5 = int_to_ptr.vmem [resolvable:$true] %s98_s5  ;;  %s5831_s19 = int_to_ptr.vmem [resolvable:$true] %s121_s19 }
  0xb5   :  { %s6597_s3 = sld [smem:[#allocation44_spill]] }
  0xbb   :  { %s5412_s1 = scalar_lea.hbm %s6597_s3, 16 }
  0xbc   :  { %p5413_p8 = scmp.ne.s32.totalorder %s6597_s3, %s5412_s1  ;;  %p5416_p9 = scmp.lt.u32.totalorder %s5412_s1, %s6597_s3 }
  0xbe   :  { %p5418_p10 = pnand %p5416_p9, %p5413_p8 }
  0xc0   :  { %5421 = shalt.err (!%p5418_p10)
}
  0xc1   :  { %s5422_s10 = scalar_lea.vmem %s99_s5, 16  ;;  %s5426_s4 = scalar_lea.vmem %s99_s5, 32 }
  0xc2   :  { %p5423_p11 = scmp.ne.s32.totalorder %s99_s5, %s5422_s10  ;;  %p5427_p12 = scmp.lt.s32.totalorder %s99_s5, %s99_s5 }
  0xc3   :  { %p5428_p13 = scmp.lt.s32.totalorder %s5426_s4, %s5422_s10 }
  0xc5   :  { %p5429_p0 = por %p5428_p13, %p5427_p12 }
  0xc7   :  { %p5430_p1 = pnand %p5429_p0, %p5423_p11 }
  0xc9   :  { %5433 = shalt.err (!%p5430_p1)
}
  0xca   :  { %101 = dma.hbm_to_vmem [thread:$0]  %s6597_s3, 16, %s99_s5, [#allocation12]  }
  0xcb   :  { %s5434_s28 = scalar_lea.hbm %s6556_s13, 1024 }
  0xcc   :  { %p5435_p2 = scmp.ne.s32.totalorder %s6556_s13, %s5434_s28  ;;  %p5438_p3 = scmp.lt.u32.totalorder %s5434_s28, %s6556_s13 }
  0xce   :  { %p5440_p4 = pnand %p5438_p3, %p5435_p2 }
  0xd0   :  { %5443 = shalt.err (!%p5440_p4)
}
  0xd1   :  { %s5444_s1 = scalar_lea.vmem %s5831_s19, 1024  ;;  %p5449_p6 = scmp.lt.s32.totalorder %s5831_s19, %s5831_s19 }
  0xd2   :  { %p5445_p5 = scmp.ne.s32.totalorder %s5831_s19, %s5444_s1  ;;  %p5450_p7 = scmp.lt.s32.totalorder %s5444_s1, %s5444_s1 }
  0xd4   :  { %p5451_p8 = por %p5450_p7, %p5449_p6 }
  0xd6   :  { %p5452_p9 = pnand %p5451_p8, %p5445_p5 }
  0xd8   :  { %5455 = shalt.err (!%p5452_p9)
}
  0xd9   :  { %127 = dma.hbm_to_vmem [thread:$0]  %s6556_s13, 1024, %s5831_s19, [#allocation15], %s5562_s2, %s5562_s2, %s5563_s26  }
  0xda   :  { %s5574_s9 = smov [#allocation19]   ;;  %s5575_s30 = smov [#allocation22]  }
  0xdb   :  { %s144_s6 = sshll.u32 %s5574_s9, 4  ;;  %s167_s29 = sshll.u32 %s5575_s30, 4  ;;  %s145_s6 = int_to_ptr.vmem [resolvable:$true] %s144_s6  ;;  %s5865_s29 = int_to_ptr.vmem [resolvable:$true] %s167_s29 }
  0xdc   :  { %s5456_s7 = scalar_lea.hbm %s6558_s15, 16 }
  0xdd   :  { %p5457_p10 = scmp.ne.s32.totalorder %s6558_s15, %s5456_s7  ;;  %p5460_p11 = scmp.lt.u32.totalorder %s5456_s7, %s6558_s15 }
  0xdf   :  { %p5462_p12 = pnand %p5460_p11, %p5457_p10 }
  0xe1   :  { %5465 = shalt.err (!%p5462_p12)
}
  0xe2   :  { %s5466_s13 = scalar_lea.vmem %s145_s6, 16  ;;  %s5470_s19 = scalar_lea.vmem %s145_s6, 32 }
  0xe3   :  { %p5467_p13 = scmp.ne.s32.totalorder %s145_s6, %s5466_s13  ;;  %p5471_p0 = scmp.lt.s32.totalorder %s145_s6, %s145_s6 }
  0xe4   :  { %p5472_p1 = scmp.lt.s32.totalorder %s5470_s19, %s5466_s13 }
  0xe6   :  { %p5473_p2 = por %p5472_p1, %p5471_p0 }
  0xe8   :  { %p5474_p3 = pnand %p5473_p2, %p5467_p13 }
  0xea   :  { %5477 = shalt.err (!%p5474_p3)
}
  0xeb   :  { %147 = dma.hbm_to_vmem [thread:$0]  %s6558_s15, 16, %s145_s6, [#allocation18]  }
  0xec   :  { %s5478_s1 = scalar_lea.hbm %s6561_s18, 512 }
  0xed   :  { %p5479_p4 = scmp.ne.s32.totalorder %s6561_s18, %s5478_s1  ;;  %p5482_p5 = scmp.lt.u32.totalorder %s5478_s1, %s6561_s18 }
  0xef   :  { %p5484_p6 = pnand %p5482_p5, %p5479_p4 }
  0xf1   :  { %5487 = shalt.err (!%p5484_p6)
}
  0xf2   :  { %s5488_s10 = scalar_lea.vmem %s5865_s29, 512  ;;  %p5493_p8 = scmp.lt.s32.totalorder %s5865_s29, %s5865_s29 }
  0xf3   :  { %p5489_p7 = scmp.ne.s32.totalorder %s5865_s29, %s5488_s10  ;;  %p5494_p9 = scmp.lt.s32.totalorder %s5488_s10, %s5488_s10 }
  0xf5   :  { %p5495_p10 = por %p5494_p9, %p5493_p8 }
  0xf7   :  { %p5496_p11 = pnand %p5495_p10, %p5489_p7 }
  0xf9   :  { %5499 = shalt.err (!%p5496_p11)
}
  0xfa   :  { %173 = dma.hbm_to_vmem [thread:$0]  %s6561_s18, 512, %s5865_s29, [#allocation21], %s5562_s2, %s5562_s2, %s5563_s26  }
  0xfb   :  { %s5576_s4 = smov [#allocation25]   ;;  %s5500_s8 = scalar_lea.hbm %s6563_s20, 16 }
  0xfc   :  { %s190_s7 = sshll.u32 %s5576_s4, 4  ;;  %p5501_p12 = scmp.ne.s32.totalorder %s6563_s20, %s5500_s8  ;;  %s191_s7 = int_to_ptr.vmem [resolvable:$true] %s190_s7 }
  0xfd   :  { %p5504_p13 = scmp.lt.u32.totalorder %s5500_s8, %s6563_s20 }
  0xff   :  { %p5506_p0 = pnand %p5504_p13, %p5501_p12 }
 0x101   :  { %5509 = shalt.err (!%p5506_p0)
}
 0x102   :  { %s5510_s25 = scalar_lea.vmem %s191_s7, 16  ;;  %s5514_s18 = scalar_lea.vmem %s191_s7, 32 }
 0x103   :  { %p5511_p1 = scmp.ne.s32.totalorder %s191_s7, %s5510_s25  ;;  %p5515_p2 = scmp.lt.s32.totalorder %s191_s7, %s191_s7 }
 0x104   :  { %p5516_p3 = scmp.lt.s32.totalorder %s5514_s18, %s5510_s25 }
 0x106   :  { %p5517_p4 = por %p5516_p3, %p5515_p2 }
 0x108   :  { %p5518_p5 = pnand %p5517_p4, %p5511_p1 }
 0x10a   :  { %5521 = shalt.err (!%p5518_p5)
}
 0x10b   :  { %193 = dma.hbm_to_vmem [thread:$0]  %s6563_s20, 16, %s191_s7, [#allocation24]  }
 0x10c   :  { %5544 = dma.done.wait [#allocation6], 768  }
 0x10d   :  { %5545 = vsyncadd [#allocation6], 4294966528 }
 0x10e   :  { %5546 = dma.done.wait [#allocation9], 32  }
 0x10f   :  { %5547 = vsyncadd [#allocation9], 4294967264 }
 0x110   :  { %5548 = dma.done.wait [#allocation12], 784  }
 0x111   :  { %5549 = vsyncadd [#allocation12], 4294966512 }
 0x112   :  { %5550 = dma.done.wait [#allocation15], 1040  }
 0x113   :  { %5551 = vsyncadd [#allocation15], 4294966256 }
 0x114   :  { %5552 = dma.done.wait [#allocation18], 32  }
 0x115   :  { %5553 = vsyncadd [#allocation18], 4294967264 }
 0x116   :  { %5554 = dma.done.wait [#allocation21], 704  }
 0x117   :  { %5555 = vsyncadd [#allocation21], 4294966592 }
 0x118   :  { %5556 = dma.done.wait [#allocation24], 32  }
 0x119   :  { %5557 = vsyncadd [#allocation24], 4294967264  ;;  %s6598_s16 = sld [smem:[#allocation35_spill]]  ;;  %vm254_vm0 = vcmask 523264   ;;  %s6599_s24 = sld [smem:[#allocation36_spill]]  ;;  %v5148_v24 = vld [vmem:[#allocation5 + $0x10] sm:$0xff]  }
 0x11a   :  { %v5149_v25 = vld [vmem:[#allocation5 + $0x18] sm:$0xff]   ;;  %v5150_v26 = vld [vmem:[#allocation5] sm:$0xff]   ;;  %s6600_s14 = sld [smem:[#allocation38_spill]]  ;;  %v5577_v29 = vmov 0.0|0.0   ;;  %vm479_vm1 = vcmask 261120   ;;  %v5151_v46 = vld [vmem:[#allocation5 + $0x8] sm:$0xff]  }
 0x11b   :  { %v5152_v47 = vld [vmem:[#allocation5 + $0x20] sm:$0xff]   ;;  %v5153_v51 = vld [vmem:[#allocation5 + $0x28] sm:$0xff]   ;;  %vm5578_vm2 = vmmov 0   ;;  %s6602_s1 = sld [smem:[#allocation43_spill]]  ;;  %vm1796_vm3 = vcmask 130048   ;;  %vm2455_vm4 = vcmask 64512  }
 0x11c   :  { %vm2910_vm5 = vcmask 257024   ;;  %s6603_s0 = sld [smem:[#allocation45_spill]]  ;;  %s5580_s10 = smov [#allocation26]   ;;  %vm3821_vm6 = vcmask 254976  }
 0x11d   :  { %s3829_s15 = sshll.u32 %s5580_s10, 4  ;;  %s3830_s15 = int_to_ptr.vmem [resolvable:$true] %s3829_s15 }
 0x11e   :  { %s5522_s6 = scalar_lea.vmem %s3830_s15, 32  ;;  %p5527_p7 = scmp.lt.s32.totalorder %s3830_s15, %s3830_s15 }
 0x11f   :  { %v242_v0 = vld [vmem:[%s6598_s16] sm:$0xff]  ;;  %v243_v1 = vld [vmem:[%s6598_s16 + $0x8] sm:$0xff]  ;;  %v244_v2 = vld [vmem:[%s6598_s16 + $0x10] sm:$0xff]  ;;  %p5523_p6 = scmp.ne.s32.totalorder %s3830_s15, %s5522_s6  ;;  %p5528_p8 = scmp.lt.s32.totalorder %s5522_s6, %s5522_s6 }
 0x120   :  { %v4870_v3 = vpack.c.bf16 %v243_v1, %v242_v0  ;;  %v245_v4 = vld [vmem:[%s6598_s16 + $0x18] sm:$0xff]  ;;  %v246_v6 = vld [vmem:[%s6598_s16 + $0x20] sm:$0xff]  ;;  %v247_v7 = vld [vmem:[%s6598_s16 + $0x28] sm:$0xff] }
 0x121   :  { %v4874_v5 = vpack.c.bf16 %v245_v4, %v244_v2  ;;  %v3848_v8 = vld [vmem:[%s6599_s24 + $0x20] sm:$0xff]  ;;  %v4878_v10 = vpack.c.bf16 %v247_v7, %v246_v6  ;;  %v248_v11 = vld [vmem:[%s6598_s16 + $0x30] sm:$0xff]  ;;  %v249_v12 = vld [vmem:[%s6598_s16 + $0x38] sm:$0xff]  ;;  %s6601_s16 = sld [smem:[#allocation42_spill]]  ;;  %p5529_p9 = por %p5528_p8, %p5527_p7 }
 0x122   :  { %4887 = vmatprep.subr.bf16.mxu1 %v4870_v3  ;;  %4871 = vmatprep.subr.bf16.mxu0 %v4870_v3  ;;  %v250_v9 = vld [vmem:[%s6599_s24] sm:$0xff]  ;;  %v4882_v13 = vpack.c.bf16 %v249_v12, %v248_v11  ;;  %v3849_v14 = vld [vmem:[%s6599_s24 + $0x28] sm:$0xff]  ;;  %v3850_v16 = vld [vmem:[%s6599_s24 + $0x30] sm:$0xff] }
 0x123   :  { %4889 = vmatpush3.bf16.msra.mxu1 %v4870_v3  ;;  %4873 = vmatpush3.bf16.msra.mxu0 %v4870_v3  ;;  %v251_v15 = vld [vmem:[%s6599_s24 + $0x8] sm:$0xff]  ;;  %v252_v17 = vld [vmem:[%s6599_s24 + $0x10] sm:$0xff]  ;;  %v3851_v18 = vld [vmem:[%s6599_s24 + $0x38] sm:$0xff]  ;;  %p5530_p10 = pnand %p5529_p9, %p5523_p6 }
 0x124   :  { %4891 = vmatprep.subr.bf16.mxu1 %v4874_v5  ;;  %4875 = vmatprep.subr.bf16.mxu0 %v4874_v5  ;;  %v253_v19 = vld [vmem:[%s6599_s24 + $0x18] sm:$0xff]  ;;  %v3864_v20 = vld [vmem:[%s6599_s24 + $0x40] sm:$0xff]  ;;  %v3865_v21 = vld [vmem:[%s6599_s24 + $0x48] sm:$0xff] }
 0x125   :  { %4359 = vmatprep.mubr.msk.f32.mxu1 %vm254_vm0, %v3848_v8  ;;  %4337 = vmatprep.mubr.msk.f32.mxu0 %vm254_vm0, %v250_v9  ;;  %v3866_v22 = vld [vmem:[%s6599_s24 + $0x50] sm:$0xff]  ;;  %v3867_v23 = vld [vmem:[%s6599_s24 + $0x58] sm:$0xff]  ;;  %v807_v27 = vld [vmem:[%s6600_s14] sm:$0xff]  ;;  %v5579_v9 = vmov 0.0  }
 0x126   :  { %v808_v28 = vld [vmem:[%s6600_s14 + $0x8] sm:$0xff]  ;;  %v809_v31 = vld [vmem:[%s6600_s14 + $0x10] sm:$0xff]  ;;  %v810_v32 = vld [vmem:[%s6600_s14 + $0x18] sm:$0xff] }
 0x127   :  { %4893 = vmatpush3.bf16.msra.mxu1 %v4874_v5  ;;  %4877 = vmatpush3.bf16.msra.mxu0 %v4874_v5  ;;  %v4919_v30 = vpack.c.bf16 %v808_v28, %v807_v27  ;;  %v4922_v33 = vpack.c.bf16 %v810_v32, %v809_v31  ;;  %v811_v55 = vld [vmem:[%s6600_s14 + $0x20] sm:$0xff]  ;;  %v812_v56 = vld [vmem:[%s6600_s14 + $0x28] sm:$0xff]  ;;  %v813_v58 = vld [vmem:[%s6600_s14 + $0x30] sm:$0xff] }
 0x128   :  { %4895 = vmatprep.subr.bf16.mxu1 %v4878_v10  ;;  %4879 = vmatprep.subr.bf16.mxu0 %v4878_v10  ;;  %v4925_v57 = vpack.c.bf16 %v812_v56, %v811_v55  ;;  %v814_v59 = vld [vmem:[%s6600_s14 + $0x38] sm:$0xff]  ;;  %v815_v61 = vld [vmem:[%s6600_s14 + $0x40] sm:$0xff]  ;;  %v816_v62 = vld [vmem:[%s6600_s14 + $0x48] sm:$0xff] }
 0x129   :  { %v4928_v60 = vpack.c.bf16 %v814_v59, %v813_v58  ;;  %v4931_v63 = vpack.c.bf16 %v816_v62, %v815_v61  ;;  %v817_v0 = vld [vmem:[%s6600_s14 + $0x50] sm:$0xff]  ;;  %v818_v1 = vld [vmem:[%s6600_s14 + $0x58] sm:$0xff]  ;;  %v820_v4 = vld [vmem:[%s6600_s14 + $0x68] sm:$0xff] }
 0x12a   :  { %v4934_v2 = vpack.c.bf16 %v818_v1, %v817_v0  ;;  %v821_v6 = vld [vmem:[%s6600_s14 + $0x70] sm:$0xff]  ;;  %v822_v7 = vld [vmem:[%s6600_s14 + $0x78] sm:$0xff] }
 0x12b   :  { %4897 = vmatpush3.bf16.msra.mxu1 %v4878_v10  ;;  %4881 = vmatpush3.bf16.msra.mxu0 %v4878_v10  ;;  %v4940_v8 = vpack.c.bf16 %v822_v7, %v821_v6  ;;  %v3876_v58 = vld [vmem:[#allocation8] ss:$0 sm:$0xff] }
 0x12c   :  { %4899 = vmatprep.subr.bf16.mxu1 %v4882_v13  ;;  %4883 = vmatprep.subr.bf16.mxu0 %v4882_v13 }
 0x12f   :  { %4901 = vmatpush3.bf16.msra.mxu1 %v4882_v13  ;;  %4885 = vmatpush3.bf16.msra.mxu0 %v4882_v13 }
 0x130   :  { %4903 = vmatprep.subr.bf16.mxu1 %v4870_v3  ;;  %4365 = vmatprep.subr.bf16.mxu0 %v5148_v24 }
 0x132   :  { %4360 = vmatmul.mubr.msk.f32.vlgmr.msra.gmra.mrb[0].mxu1 %vm254_vm0, %v3849_v14  ;;  %4338 = vmatmul.mubr.msk.f32.vlgmr.msra.gmra.mrb[0].mxu0 %vm254_vm0, %v251_v15 }
 0x133   :  { %4362 = vmatprep.mubr.msk.f32.mxu1 %vm254_vm0, %v3850_v16  ;;  %4905 = vmatpush3.bf16.msra.mxu1 %v4870_v3  ;;  %v819_v3 = vld [vmem:[%s6600_s14 + $0x60] sm:$0xff] }
 0x134   :  { %4907 = vmatprep.subr.bf16.mxu1 %v4874_v5  ;;  %4340 = vmatprep.mubr.msk.f32.mxu0 %vm254_vm0, %v252_v17 }
 0x135   :  { %4366 = vmatpush3.bf16.msra.mxu0 %v5148_v24 }
 0x136   :  { %4363 = vmatmul.mubr.msk.f32.gmra.mrb[2].mxu1 %vm254_vm0, %v3851_v18  ;;  %4341 = vmatmul.mubr.msk.f32.gmra.mrb[2].mxu0 %vm254_vm0, %v253_v19 }
 0x137   :  { %4909 = vmatpush3.bf16.msra.mxu1 %v4874_v5  ;;  %4397 = vmatprep.mubr.msk.f32.mxu1 %vm254_vm0, %v3864_v20  ;;  %v4937_v5 = vpack.c.bf16 %v820_v4, %v819_v3 }
 0x138   :  { %4911 = vmatprep.subr.bf16.mxu1 %v4878_v10  ;;  %4367 = vmatprep.subr.bf16.mxu0 %v5149_v25 }
 0x139   :  { %4368 = vmatpush3.bf16.msra.mxu0 %v5149_v25 }
 0x13a   :  { %4373 = vmatprep.subr.bf16.mxu0 %v5150_v26 }
 0x13b   :  { %4913 = vmatpush3.bf16.msra.mxu1 %v4878_v10 }
 0x13c   :  { %4915 = vmatprep.subr.bf16.mxu1 %v4882_v13 }
 0x13f   :  { %4917 = vmatpush3.bf16.msra.mxu1 %v4882_v13 }
 0x140   :  { %4918 = vmatprep.subr.bf16.mxu1 %v5577_v29 }
 0x142   :  { %4398 = vmatmul.mubr.msk.f32.vlgmr.msra.gmra.mrb[4].mxu1 %vm254_vm0, %v3865_v21 }
 0x143   :  { %4400 = vmatprep.mubr.msk.f32.mxu1 %vm254_vm0, %v3866_v22  ;;  %4920 = vmatpush3.bf16.msra.mxu1 %v4919_v30 }
 0x144   :  { %4921 = vmatprep.subr.bf16.mxu1 %v5577_v29 }
 0x146   :  { %4401 = vmatmul.mubr.msk.f32.gmra.mrb[6].mxu1 %vm254_vm0, %v3867_v23 }
 0x147   :  { %4923 = vmatpush3.bf16.msra.mxu1 %v4922_v33  ;;  %4443 = vmatprep.mubr.msk.f32.mxu1 %vm5578_vm2, %v5579_v9 }
 0x148   :  { %4924 = vmatprep.subr.bf16.mxu1 %v5577_v29 }
 0x14b   :  { %4926 = vmatpush3.bf16.msra.mxu1 %v4925_v57 }
 0x14c   :  { %4927 = vmatprep.subr.bf16.mxu1 %v5577_v29 }
 0x14f   :  { %4929 = vmatpush3.bf16.msra.mxu1 %v4928_v60 }
 0x150   :  { %4930 = vmatprep.subr.bf16.mxu1 %v5577_v29 }
 0x153   :  { %4932 = vmatpush3.bf16.msra.mxu1 %v4931_v63 }
 0x154   :  { %4933 = vmatprep.subr.bf16.mxu1 %v5577_v29 }
 0x157   :  { %4935 = vmatpush3.bf16.msra.mxu1 %v4934_v2 }
 0x158   :  { %4936 = vmatprep.subr.bf16.mxu1 %v5577_v29 }
 0x15b   :  { %4938 = vmatpush3.bf16.msra.mxu1 %v4937_v5 }
 0x15c   :  { %4939 = vmatprep.subr.bf16.mxu1 %v5577_v29 }
 0x15f   :  { %4941 = vmatpush3.bf16.msra.mxu1 %v4940_v8 }
 0x205   :  { %v4361_v34 = vpop.f32.mrb[0].mxu1  ;;  %v4339_v35 = vpop.f32.mrb[0].mxu0 }
 0x206   :  { %v441_v36 = vpop.f32.mrb[1].mxu1  ;;  %v333_v37 = vpop.f32.mrb[1].mxu0 }
 0x207   :  { %v460_v38 = vpack.c.bf16 %v4361_v34, %v441_v36  ;;  %v352_v39 = vpack.c.bf16 %v4339_v35, %v333_v37 }
 0x209   :  { %v4364_v40 = vpop.f32.mrb[2].mxu1  ;;  %4369 = vmatprep.mubr.msk.bf16.mxu0 %vm479_vm1, %v460_v38  ;;  %v4342_v41 = vpop.f32.mrb[2].mxu0 }
 0x20a   :  { %v451_v42 = vpop.f32.mrb[3].mxu1  ;;  %v343_v43 = vpop.f32.mrb[3].mxu0 }
 0x20b   :  { %v461_v44 = vpack.c.bf16 %v4364_v40, %v451_v42  ;;  %v353_v45 = vpack.c.bf16 %v4342_v41, %v343_v43  ;;  %v1009_v40 = vld [vmem:[#allocation11] sm:$0xff]  ;;  %v965_v41 = vlaneseq }
 0x20d   :  { %4370 = vmatmul.mubr.msk.bf16.vlgmr.msra.gmra.mrb[4].mxu0 %vm479_vm1, %v461_v44  ;;  %v966_v42 = vshrl.u32 %v965_v41, 7  ;;  %v5166_v41 = vld [vmem:[%s6601_s16 + $0x20] sm:$0xff]  }
 0x20e   :  { %4374 = vmatpush3.bf16.msra.mxu0 %v5150_v26  ;;  %4377 = vmatprep.mubr.msk.bf16.mxu0 %vm479_vm1, %v352_v39  ;;  %v1110_v39 = vld [vmem:[#allocation11 + $0x10] sm:$0xff] }
 0x20f   :  { %4375 = vmatprep.subr.bf16.mxu0 %v5151_v46  ;;  %v6059_v43 = vsub.s32 0, %v966_v42  ;;  %v5167_v42 = vld [vmem:[%s6601_s16 + $0x28] sm:$0xff]  }
 0x212   :  { %4376 = vmatpush3.bf16.msra.mxu0 %v5151_v46 }
 0x213   :  { %4403 = vmatprep.subr.bf16.mxu0 %v5152_v47 }
 0x215   :  { %v4399_v48 = vpop.f32.mrb[4].mxu1 }
 0x216   :  { %v685_v49 = vpop.f32.mrb[5].mxu1 }
 0x217   :  { %v704_v50 = vpack.c.bf16 %v4399_v48, %v685_v49 }
 0x219   :  { %4378 = vmatmul.mubr.msk.bf16.vlgmr.msra.gmra.mrb[4].mxu0 %vm479_vm1, %v353_v45  ;;  %v4402_v52 = vpop.f32.mrb[6].mxu1 }
 0x21a   :  { %4404 = vmatpush3.bf16.msra.mxu0 %v5152_v47  ;;  %4407 = vmatprep.mubr.msk.bf16.mxu0 %vm479_vm1, %v704_v50  ;;  %v695_v53 = vpop.f32.mrb[7].mxu1 }
 0x21b   :  { %v705_v54 = vpack.c.bf16 %v4402_v52, %v695_v53  ;;  %4405 = vmatprep.subr.bf16.mxu0 %v5153_v51 }
 0x21e   :  { %4406 = vmatpush3.bf16.msra.mxu0 %v5153_v51 }
 0x21f   :  { %4942 = vmatprep.subr.bf16.mxu0 %v5577_v29 }
 0x225   :  { %4408 = vmatmul.mubr.msk.bf16.vlgmr.msra.gmra.mrb[4].mxu0 %vm479_vm1, %v705_v54 }
 0x226   :  { %4944 = vmatpush3.bf16.msra.mxu0 %v4919_v30  ;;  %4478 = vmatprep.mubr.msk.f32.mxu0 %vm5578_vm2, %v5579_v9 }
 0x227   :  { %4945 = vmatprep.subr.bf16.mxu0 %v5577_v29 }
 0x22a   :  { %4947 = vmatpush3.bf16.msra.mxu0 %v4922_v33 }
 0x22b   :  { %4948 = vmatprep.subr.bf16.mxu0 %v5577_v29 }
 0x22e   :  { %4950 = vmatpush3.bf16.msra.mxu0 %v4925_v57 }
 0x22f   :  { %4951 = vmatprep.subr.bf16.mxu0 %v5577_v29 }
 0x232   :  { %4953 = vmatpush3.bf16.msra.mxu0 %v4928_v60 }
 0x233   :  { %4954 = vmatprep.subr.bf16.mxu0 %v5577_v29 }
 0x236   :  { %4956 = vmatpush3.bf16.msra.mxu0 %v4931_v63  ;;  %v3877_v63 = vld [vmem:[#allocation10] ss:$0 sm:$0xff] }
 0x237   :  { %4957 = vmatprep.subr.bf16.mxu0 %v5577_v29 }
 0x23a   :  { %4959 = vmatpush3.bf16.msra.mxu0 %v4934_v2 }
 0x23b   :  { %4960 = vmatprep.subr.bf16.mxu0 %v5577_v29 }
 0x23e   :  { %4962 = vmatpush3.bf16.msra.mxu0 %v4937_v5 }
 0x23f   :  { %4963 = vmatprep.subr.bf16.mxu0 %v5577_v29 }
 0x242   :  { %4965 = vmatpush3.bf16.msra.mxu0 %v4940_v8 }
 0x2f8   :  { %v4409_v10 = vpop.f32.mrb[4].mxu0 }
 0x2f9   :  { %v763_v11 = vpop.f32.mrb[5].mxu0  ;;  %v795_v17 = vmul.f32 %v4409_v10, %v4409_v10 }
 0x2fa   :  { %v4410_v12 = vpop.f32.mrb[6].mxu0  ;;  %v793_v14 = vmul.f32 %v763_v11, %v763_v11 }
 0x2fb   :  { %v766_v13 = vpop.f32.mrb[7].mxu0  ;;  %v796_v20 = vmul.f32 %v4410_v12, %v4410_v12 }
 0x2fc   :  { %v782_v15 = vadd.f32 %v766_v13, %v763_v11  ;;  %v794_v16 = vmul.f32 %v766_v13, %v766_v13 }
 0x2fe   :  { %v783_v18 = vadd.f32 %v4409_v10, %v782_v15  ;;  %v797_v19 = vadd.f32 %v794_v16, %v793_v14  ;;  %v1111_v15 = vld [vmem:[#allocation11 + $0x18] sm:$0xff]  ;;  %v1010_v16 = vld [vmem:[#allocation11 + $0x8] sm:$0xff] }
 0x300   :  { %v784_v21 = vadd.f32 %v4410_v12, %v783_v18  ;;  %v798_v22 = vadd.f32 %v797_v19, %v795_v17  ;;  %v1390_v17 = vld [vmem:[#allocation11 + $0x20] sm:$0xff]  ;;  %v5155_v19 = vld [vmem:[%s6601_s16 + $0x48] sm:$0xff]  }
 0x301   :  { %v5154_v18 = vld [vmem:[%s6601_s16 + $0x40] sm:$0xff]  }
 0x302   :  { %v785_v23 = vrot.slane %v784_v21, 4  ;;  %v799_v24 = vadd.f32 %v798_v22, %v796_v20  ;;  %v1391_v20 = vld [vmem:[#allocation11 + $0x28] sm:$0xff]  ;;  %v5157_v22 = vld [vmem:[%s6601_s16 + $0x58] sm:$0xff]  }
 0x304   :  { %v786_v25 = vadd.f32 %v785_v23, %v784_v21  ;;  %v800_v26 = vrot.slane %v799_v24, 4  ;;  %v5156_v21 = vld [vmem:[%s6601_s16 + $0x50] sm:$0xff]   ;;  %v5158_v23 = vld [vmem:[%s6601_s16 + $0x60] sm:$0xff]  }
 0x306   :  { %v787_v27 = vrot.slane %v786_v25, 2  ;;  %v801_v28 = vadd.f32 %v800_v26, %v799_v24  ;;  %v5159_v24 = vld [vmem:[%s6601_s16 + $0x68] sm:$0xff]   ;;  %v5161_v26 = vld [vmem:[%s6601_s16 + $0x78] sm:$0xff]  }
 0x308   :  { %v788_v30 = vadd.f32 %v787_v27, %v786_v25  ;;  %v802_v31 = vrot.slane %v801_v28, 2  ;;  %v5160_v25 = vld [vmem:[%s6601_s16 + $0x70] sm:$0xff]  }
 0x30a   :  { %v789_v32 = vrot.slane %v788_v30, 1  ;;  %v803_v33 = vadd.f32 %v802_v31, %v801_v28  ;;  %v5162_v31 = vld [vmem:[%s6601_s16] sm:$0xff]  }
 0x30c   :  { %v790_v34 = vadd.f32 %v789_v32, %v788_v30  ;;  %v804_v35 = vrot.slane %v803_v33, 1 }
 0x30e   :  { %v792_v36 = vmul.f32 0.03125, %v790_v34  ;;  %v805_v37 = vadd.f32 %v804_v35, %v803_v33  ;;  %v5163_v35 = vld [vmem:[%s6601_s16 + $0x8] sm:$0xff]  }
 0x310   :  { %4444 = vmatmul.mubr.f32.vlgmr.msra.gmra.mrb[8].mxu1 %v792_v36  ;;  %v806_v38 = vmul.f32 0.03125, %v805_v37  ;;  %v5164_v37 = vld [vmem:[%s6601_s16 + $0x10] sm:$0xff]  }
 0x311   :  { %4489 = vmatprep.mubr.msk.f32.mxu1 %vm479_vm1, %v1009_v40  ;;  %v5165_v40 = vld [vmem:[%s6601_s16 + $0x18] sm:$0xff]  }
 0x312   :  { %4479 = vmatmul.mubr.f32.vlgmr.msra.gmra.mrb[8].mxu0 %v806_v38 }
 0x313   :  { %4500 = vmatprep.mubr.msk.f32.mxu0 %vm479_vm1, %v1110_v39 }
 0x3e3   :  { %v889_v44 = vpop.f32.mrb[8].mxu1 }
 0x3e4   :  { %v963_v45 = vmul.f32 %v889_v44, %v889_v44  ;;  %v968_v46 = vrot.slane %v889_v44, %v6059_v43  ;;  %v4445_v47 = vpop.f32.mrb[9].mxu1  ;;  %v5168_v44 = vld [vmem:[%s6601_s16 + $0x30] sm:$0xff]  }
 0x3e5   :  { %v959_v48 = vpop.f32.mrb[8].mxu0  ;;  %v5171_v47 = vld [vmem:[%s6601_s16 + $0x88] sm:$0xff]  }
 0x3e6   :  { %v969_v49 = vsub.f32 %v763_v11, %v968_v46  ;;  %v970_v50 = vsub.f32 %v766_v13, %v968_v46  ;;  %v971_v51 = vsub.f32 %v4409_v10, %v968_v46  ;;  %v972_v52 = vsub.f32 %v4410_v12, %v968_v46  ;;  %v4480_v53 = vpop.f32.mrb[9].mxu0  ;;  %v5170_v46 = vld [vmem:[%s6601_s16 + $0x80] sm:$0xff]  }
 0x3e7   :  { %v964_v54 = vsub.f32 %v959_v48, %v963_v45  ;;  %v5169_v45 = vld [vmem:[%s6601_s16 + $0x38] sm:$0xff]   ;;  %v5172_v48 = vld [vmem:[%s6601_s16 + $0x90] sm:$0xff]  }
 0x3e8   :  { %v5177_v53 = vld [vmem:[%s6601_s16 + $0xb8] sm:$0xff]  }
 0x3e9   :  { %v973_v55 = vadd.f32 1e-05, %v964_v54  ;;  %v1605_v54 = vld [vmem:[%s6602_s1] sm:$0xff] }
 0x3eb   :  { %5208 = vrsqrt.f32 %v973_v55  ;;  %v1606_v55 = vld [vmem:[%s6602_s1 + $0x8] sm:$0xff] }
 0x3f5   :  { %v5209_v56 = vpop.eup %5208 }
 0x3f6   :  { %v978_v57 = vrot.slane %v5209_v56, %v6059_v43  ;;  %v4991_v56 = vpack.c.bf16 %v1606_v55, %v1605_v54  ;;  %v1795_v54 = vld [vmem:[%s6554_s11] sm:$0xff]  ;;  %v3945_v55 = vld [vmem:[%s6554_s11 + $0x8] sm:$0xff] }
 0x3f8   :  { %v979_v59 = vmul.f32 %v978_v57, %v969_v49  ;;  %v980_v60 = vmul.f32 %v978_v57, %v970_v50  ;;  %v981_v61 = vmul.f32 %v978_v57, %v971_v51  ;;  %v982_v62 = vmul.f32 %v978_v57, %v972_v52  ;;  %v5173_v49 = vld [vmem:[%s6601_s16 + $0x98] sm:$0xff]   ;;  %v5174_v50 = vld [vmem:[%s6601_s16 + $0xa0] sm:$0xff]   ;;  %v5175_v51 = vld [vmem:[%s6601_s16 + $0xa8] sm:$0xff]  }
 0x3f9   :  { %v5176_v52 = vld [vmem:[%s6601_s16 + $0xb0] sm:$0xff]  }
 0x3fa   :  { %v990_v0 = vmul.f32 %v3876_v58, %v979_v59  ;;  %v991_v1 = vmul.f32 %v3876_v58, %v980_v60  ;;  %v992_v2 = vmul.f32 %v3876_v58, %v981_v61  ;;  %v993_v3 = vmul.f32 %v3876_v58, %v982_v62  ;;  %v1607_v57 = vld [vmem:[%s6602_s1 + $0x10] sm:$0xff]  ;;  %v1608_v58 = vld [vmem:[%s6602_s1 + $0x18] sm:$0xff]  ;;  %v1609_v60 = vld [vmem:[%s6602_s1 + $0x20] sm:$0xff] }
 0x3fb   :  { %v4994_v59 = vpack.c.bf16 %v1608_v58, %v1607_v57  ;;  %v1610_v61 = vld [vmem:[%s6602_s1 + $0x28] sm:$0xff]  ;;  %v5180_v58 = vld [vmem:[%s6555_s12 + $0x30] sm:$0xff]  }
 0x3fc   :  { %v1001_v4 = vadd.f32 %v3877_v63, %v990_v0  ;;  %v1002_v5 = vadd.f32 %v3877_v63, %v991_v1  ;;  %v1003_v6 = vadd.f32 %v3877_v63, %v992_v2  ;;  %v1004_v7 = vadd.f32 %v3877_v63, %v993_v3  ;;  %v1611_v63 = vld [vmem:[%s6602_s1 + $0x30] sm:$0xff]  ;;  %v1612_v0 = vld [vmem:[%s6602_s1 + $0x38] sm:$0xff]  ;;  %v5179_v57 = vld [vmem:[%s6555_s12 + $0x28] sm:$0xff]  }
 0x3fd   :  { %v4997_v62 = vpack.c.bf16 %v1610_v61, %v1609_v60  ;;  %v5000_v1 = vpack.c.bf16 %v1612_v0, %v1611_v63  ;;  %v5182_v63 = vld [vmem:[%s6555_s12] sm:$0xff]  }
 0x3fe   :  { %v1005_v8 = vmax.f32 %v1001_v4, 0.0  ;;  %v1006_v10 = vmax.f32 %v1002_v5, 0.0  ;;  %v1007_v11 = vmax.f32 %v1003_v6, 0.0  ;;  %v1008_v12 = vmax.f32 %v1004_v7, 0.0 }
 0x400   :  { %v4966_v13 = vpack.c.bf16 %v1006_v10, %v1005_v8  ;;  %v4970_v14 = vpack.c.bf16 %v1008_v12, %v1007_v11 }
 0x402   :  { %4967 = vmatprep.subr.bf16.mxu1 %v4966_v13  ;;  %4975 = vmatprep.subr.bf16.mxu0 %v4966_v13 }
 0x403   :  { %4969 = vmatpush3.bf16.msra.mxu1 %v4966_v13  ;;  %4977 = vmatpush3.bf16.msra.mxu0 %v4966_v13 }
 0x404   :  { %4971 = vmatprep.subr.bf16.mxu1 %v4970_v14  ;;  %4979 = vmatprep.subr.bf16.mxu0 %v4970_v14 }
 0x407   :  { %4973 = vmatpush3.bf16.msra.mxu1 %v4970_v14  ;;  %4981 = vmatpush3.bf16.msra.mxu0 %v4970_v14 }
 0x408   :  { %4983 = vmatprep.subr.bf16.mxu0 %v4966_v13  ;;  %4503 = vmatprep.subr.bf16.mxu1 %v5579_v9 }
 0x40a   :  { %4501 = vmatmul.mubr.msk.f32.vlgmr.msra.gmra.mrb[10].mxu0 %vm479_vm1, %v1111_v15  ;;  %4490 = vmatmul.mubr.msk.f32.vlgmr.msra.gmra.mrb[10].mxu1 %vm479_vm1, %v1010_v16 }
 0x40b   :  { %4985 = vmatpush3.bf16.msra.mxu0 %v4966_v13  ;;  %4551 = vmatprep.mubr.msk.f32.mxu0 %vm479_vm1, %v1390_v17 }
 0x40c   :  { %4987 = vmatprep.subr.bf16.mxu0 %v4970_v14  ;;  %4504 = vmatpush3.bf16.msra.mxu1 %v5154_v18 }
 0x40d   :  { %4505 = vmatprep.subr.bf16.mxu1 %v5579_v9  ;;  %4519 = vmatprep.mubr.msk.bf16.mxu1 %vm5578_vm2, %v5579_v9 }
 0x40f   :  { %4989 = vmatpush3.bf16.msra.mxu0 %v4970_v14 }
 0x410   :  { %4506 = vmatpush3.bf16.msra.mxu1 %v5155_v19  ;;  %4990 = vmatprep.subr.bf16.mxu0 %v5577_v29 }
 0x411   :  { %4507 = vmatprep.subr.bf16.mxu1 %v5579_v9 }
 0x412   :  { %4552 = vmatmul.mubr.msk.f32.vlgmr.msra.gmra.mrb[12].mxu0 %vm479_vm1, %v1391_v20 }
 0x413   :  { %4590 = vmatprep.mubr.msk.f32.mxu0 %vm5578_vm2, %v5579_v9  ;;  %4992 = vmatpush3.bf16.msra.mxu0 %v4991_v56 }
 0x414   :  { %4508 = vmatpush3.bf16.msra.mxu1 %v5156_v21  ;;  %4993 = vmatprep.subr.bf16.mxu0 %v5577_v29 }
 0x415   :  { %4509 = vmatprep.subr.bf16.mxu1 %v5579_v9 }
 0x417   :  { %4995 = vmatpush3.bf16.msra.mxu0 %v4994_v59 }
 0x418   :  { %4510 = vmatpush3.bf16.msra.mxu1 %v5157_v22  ;;  %4996 = vmatprep.subr.bf16.mxu0 %v5577_v29 }
 0x419   :  { %4511 = vmatprep.subr.bf16.mxu1 %v5579_v9 }
 0x41b   :  { %4998 = vmatpush3.bf16.msra.mxu0 %v4997_v62 }
 0x41c   :  { %4512 = vmatpush3.bf16.msra.mxu1 %v5158_v23  ;;  %4999 = vmatprep.subr.bf16.mxu0 %v5577_v29 }
 0x41d   :  { %4513 = vmatprep.subr.bf16.mxu1 %v5579_v9 }
 0x41f   :  { %5001 = vmatpush3.bf16.msra.mxu0 %v5000_v1 }
 0x420   :  { %4514 = vmatpush3.bf16.msra.mxu1 %v5159_v24  ;;  %5002 = vmatprep.subr.bf16.mxu0 %v5577_v29 }
 0x421   :  { %4515 = vmatprep.subr.bf16.mxu1 %v5579_v9 }
 0x424   :  { %4516 = vmatpush3.bf16.msra.mxu1 %v5160_v25 }
 0x425   :  { %4517 = vmatprep.subr.bf16.mxu1 %v5579_v9 }
 0x428   :  { %4518 = vmatpush3.bf16.msra.mxu1 %v5161_v26 }
 0x429   :  { %4523 = vmatprep.subr.bf16.mxu1 %v5579_v9 }
 0x4dd   :  { %v4502_v27 = vpop.f32.mrb[10].mxu0  ;;  %v4491_v28 = vpop.f32.mrb[10].mxu1 }
 0x4de   :  { %v1184_v30 = vpop.f32.mrb[11].mxu0  ;;  %v1083_v32 = vpop.f32.mrb[11].mxu1 }
 0x4df   :  { %v1193_v33 = vpack.c.bf16 %v4502_v27, %v1184_v30  ;;  %v1092_v34 = vpack.c.bf16 %v4491_v28, %v1083_v32 }
 0x4e1   :  { %4520 = vmatmul.mubr.bf16.vlgmr.msra.gmra.mrb[12].mxu1 %v1193_v33 }
 0x4e2   :  { %4524 = vmatpush3.bf16.msra.mxu1 %v5162_v31  ;;  %4539 = vmatprep.mubr.msk.bf16.mxu1 %vm5578_vm2, %v5579_v9 }
 0x4e3   :  { %4525 = vmatprep.subr.bf16.mxu1 %v5579_v9 }
 0x4e5   :  { %v4553_v36 = vpop.f32.mrb[12].mxu0 }
 0x4e6   :  { %4526 = vmatpush3.bf16.msra.mxu1 %v5163_v35  ;;  %v1464_v38 = vpop.f32.mrb[13].mxu0 }
 0x4e7   :  { %4527 = vmatprep.subr.bf16.mxu1 %v5579_v9  ;;  %v1473_v39 = vpack.c.bf16 %v4553_v36, %v1464_v38 }
 0x4ea   :  { %4528 = vmatpush3.bf16.msra.mxu1 %v5164_v37 }
 0x4eb   :  { %4529 = vmatprep.subr.bf16.mxu1 %v5579_v9 }
 0x4ee   :  { %4530 = vmatpush3.bf16.msra.mxu1 %v5165_v40 }
 0x4ef   :  { %4531 = vmatprep.subr.bf16.mxu1 %v5579_v9 }
 0x4f2   :  { %4532 = vmatpush3.bf16.msra.mxu1 %v5166_v41 }
 0x4f3   :  { %4533 = vmatprep.subr.bf16.mxu1 %v5579_v9 }
 0x4f6   :  { %4534 = vmatpush3.bf16.msra.mxu1 %v5167_v42  ;;  %v3942_v42 = vld [vmem:[#allocation13] ss:$0 sm:$0xff] }
 0x4f7   :  { %4535 = vmatprep.subr.bf16.mxu1 %v5579_v9 }
 0x4fa   :  { %4536 = vmatpush3.bf16.msra.mxu1 %v5168_v44 }
 0x4fb   :  { %4537 = vmatprep.subr.bf16.mxu1 %v5579_v9 }
 0x4fe   :  { %4538 = vmatpush3.bf16.msra.mxu1 %v5169_v45 }
 0x4ff   :  { %4554 = vmatprep.subr.bf16.mxu1 %v5579_v9 }
 0x501   :  { %4540 = vmatmul.mubr.bf16.vlgmr.msra.gmra.mrb[12].mxu1 %v1092_v34 }
 0x502   :  { %4555 = vmatpush3.bf16.msra.mxu1 %v5170_v46  ;;  %4570 = vmatprep.mubr.msk.bf16.mxu1 %vm5578_vm2, %v5579_v9  ;;  %v3943_v46 = vld [vmem:[#allocation14] ss:$0 sm:$0xff] }
 0x503   :  { %4556 = vmatprep.subr.bf16.mxu1 %v5579_v9 }
 0x506   :  { %4557 = vmatpush3.bf16.msra.mxu1 %v5171_v47 }
 0x507   :  { %4558 = vmatprep.subr.bf16.mxu1 %v5579_v9 }
 0x50a   :  { %4559 = vmatpush3.bf16.msra.mxu1 %v5172_v48 }
 0x50b   :  { %4560 = vmatprep.subr.bf16.mxu1 %v5579_v9 }
 0x50e   :  { %4561 = vmatpush3.bf16.msra.mxu1 %v5173_v49 }
 0x50f   :  { %4562 = vmatprep.subr.bf16.mxu1 %v5579_v9 }
 0x512   :  { %4563 = vmatpush3.bf16.msra.mxu1 %v5174_v50 }
 0x513   :  { %4564 = vmatprep.subr.bf16.mxu1 %v5579_v9 }
 0x516   :  { %4565 = vmatpush3.bf16.msra.mxu1 %v5175_v51 }
 0x517   :  { %4566 = vmatprep.subr.bf16.mxu1 %v5579_v9 }
 0x51a   :  { %4567 = vmatpush3.bf16.msra.mxu1 %v5176_v52 }
 0x51b   :  { %4568 = vmatprep.subr.bf16.mxu1 %v5579_v9 }
 0x51e   :  { %4569 = vmatpush3.bf16.msra.mxu1 %v5177_v53 }
 0x51f   :  { %5023 = vmatprep.subr.bf16.mxu1 %v5577_v29 }
 0x521   :  { %4571 = vmatmul.mubr.bf16.vlgmr.msra.gmra.mrb[12].mxu1 %v1473_v39 }
 0x522   :  { %4685 = vmatprep.mubr.msk.f32.mxu1 %vm5578_vm2, %v5579_v9 }
 0x5f4   :  { %v1573_v2 = vpop.f32.mrb[12].mxu1 }
 0x5f5   :  { %v1593_v3 = vmul.f32 %v1573_v2, %v1573_v2  ;;  %v4572_v4 = vpop.f32.mrb[13].mxu1  ;;  %v1582_v6 = vsel %vm254_vm0, %v1573_v2, 0.0 }
 0x5f6   :  { %v1576_v5 = vpop.f32.mrb[14].mxu1  ;;  %v5185_v4 = vld [vmem:[%s6555_s12 + $0x18] sm:$0xff]  }
 0x5f7   :  { %v1583_v7 = vsel %vm254_vm0, %v1576_v5, 0.0  ;;  %v1594_v8 = vmul.f32 %v1576_v5, %v1576_v5  ;;  %v4573_v10 = vpop.f32.mrb[15].mxu1  ;;  %v1595_v12 = vsel %vm254_vm0, %v1593_v3, 0.0  ;;  %v5184_v3 = vld [vmem:[%s6555_s12 + $0x10] sm:$0xff]  }
 0x5f8   :  { %v1584_v11 = vadd.f32 %v1583_v7, %v1582_v6  ;;  %v3965_v6 = vld [vmem:[%s6554_s11 + $0x10] sm:$0xff]  ;;  %v5186_v7 = vld [vmem:[%s6555_s12 + $0x40] sm:$0xff]  }
 0x5f9   :  { %v1596_v13 = vsel %vm254_vm0, %v1594_v8, 0.0  ;;  %v5187_v8 = vld [vmem:[%s6555_s12 + $0x48] sm:$0xff]   ;;  %v5188_v10 = vld [vmem:[%s6555_s12 + $0x50] sm:$0xff]  }
 0x5fa   :  { %v1585_v14 = vrot.slane %v1584_v11, 4  ;;  %v1597_v15 = vadd.f32 %v1596_v13, %v1595_v12 }
 0x5fc   :  { %v1586_v16 = vadd.f32 %v1585_v14, %v1584_v11  ;;  %v1598_v18 = vrot.slane %v1597_v15, 4  ;;  %v5189_v11 = vld [vmem:[%s6555_s12 + $0x58] sm:$0xff]  }
 0x5fe   :  { %v1587_v17 = vrot.slane %v1586_v16, 2  ;;  %v1599_v21 = vadd.f32 %v1598_v18, %v1597_v15  ;;  %v2269_v15 = vld [vmem:[#allocation16] sm:$0xff]  ;;  %v2271_v18 = vld [vmem:[#allocation16 + $0x10] sm:$0xff] }
 0x600   :  { %v1588_v19 = vadd.f32 %v1587_v17, %v1586_v16  ;;  %v1600_v24 = vrot.slane %v1599_v21, 2  ;;  %v2270_v16 = vld [vmem:[#allocation16 + $0x8] sm:$0xff] }
 0x601   :  { %v5024_v17 = vpack.c.bf16 %v2270_v16, %v2269_v15  ;;  %v5194_v16 = vld [vmem:[%s6560_s17] sm:$0xff]  }
 0x602   :  { %v1589_v20 = vrot.slane %v1588_v19, 1  ;;  %v1601_v25 = vadd.f32 %v1600_v24, %v1599_v21  ;;  %v2273_v21 = vld [vmem:[#allocation16 + $0x20] sm:$0xff]  ;;  %v2275_v24 = vld [vmem:[#allocation16 + $0x30] sm:$0xff] }
 0x603   :  { %5025 = vmatpush3.bf16.msra.mxu1 %v5024_v17 }
 0x604   :  { %v1590_v22 = vadd.f32 %v1589_v20, %v1588_v19  ;;  %v1602_v26 = vrot.slane %v1601_v25, 1  ;;  %5026 = vmatprep.subr.bf16.mxu1 %v5577_v29  ;;  %v2272_v19 = vld [vmem:[#allocation16 + $0x18] sm:$0xff] }
 0x605   :  { %v5027_v20 = vpack.c.bf16 %v2272_v19, %v2271_v18  ;;  %v5195_v19 = vld [vmem:[%s6560_s17 + $0x8] sm:$0xff]  }
 0x606   :  { %v1592_v23 = vmul.f32 0.0625, %v1590_v22  ;;  %v1603_v27 = vadd.f32 %v1602_v26, %v1601_v25  ;;  %v2274_v22 = vld [vmem:[#allocation16 + $0x28] sm:$0xff]  ;;  %v2276_v25 = vld [vmem:[#allocation16 + $0x38] sm:$0xff] }
 0x607   :  { %5028 = vmatpush3.bf16.msra.mxu1 %v5027_v20  ;;  %v5033_v26 = vpack.c.bf16 %v2276_v25, %v2275_v24  ;;  %v5199_v24 = vld [vmem:[%s6560_s17 + $0x48] sm:$0xff]   ;;  %v5200_v25 = vld [vmem:[%s6560_s17 + $0x50] sm:$0xff]  }
 0x608   :  { %4591 = vmatmul.mubr.msk.f32.vlgmr.msra.gmra.mrb[14].mxu0 %vm254_vm0, %v1592_v23  ;;  %v1604_v28 = vmul.f32 0.0625, %v1603_v27  ;;  %5029 = vmatprep.subr.bf16.mxu1 %v5577_v29  ;;  %v5030_v23 = vpack.c.bf16 %v2274_v22, %v2273_v21  ;;  %v5197_v21 = vld [vmem:[%s6560_s17 + $0x18] sm:$0xff]   ;;  %v5198_v22 = vld [vmem:[%s6560_s17 + $0x40] sm:$0xff]  }
 0x609   :  { %5004 = vmatpush3.bf16.msra.mxu0 %v4991_v56  ;;  %4609 = vmatprep.mubr.msk.f32.mxu0 %vm5578_vm2, %v5579_v9  ;;  %v5178_v56 = vld [vmem:[%s6555_s12 + $0x20] sm:$0xff]  }
 0x60a   :  { %5005 = vmatprep.subr.bf16.mxu0 %v5577_v29 }
 0x60b   :  { %5031 = vmatpush3.bf16.msra.mxu1 %v5030_v23 }
 0x60c   :  { %5032 = vmatprep.subr.bf16.mxu1 %v5577_v29 }
 0x60d   :  { %5007 = vmatpush3.bf16.msra.mxu0 %v4994_v59  ;;  %v5181_v59 = vld [vmem:[%s6555_s12 + $0x38] sm:$0xff]  }
 0x60e   :  { %5008 = vmatprep.subr.bf16.mxu0 %v5577_v29 }
 0x60f   :  { %5034 = vmatpush3.bf16.msra.mxu1 %v5033_v26 }
 0x610   :  { %4707 = vmatprep.subr.mxu1 %v5579_v9 }
 0x611   :  { %5010 = vmatpush3.bf16.msra.mxu0 %v4997_v62 }
 0x612   :  { %5011 = vmatprep.subr.bf16.mxu0 %v5577_v29 }
 0x615   :  { %5013 = vmatpush3.bf16.msra.mxu0 %v5000_v1 }
 0x616   :  { %5014 = vmatprep.subr.bf16.mxu0 %v5577_v29 }
 0x618   :  { %4610 = vmatmul.mubr.msk.f32.vlgmr.msra.gmra.mrb[16].mxu0 %vm254_vm0, %v1604_v28 }
 0x619   :  { %4616 = vmatprep.mubr.msk.f32.mxu0 %vm5578_vm2, %v5579_v9 }
 0x6db   :  { %v1682_v30 = vpop.f32.mrb[14].mxu0 }
 0x6dc   :  { %v1764_v31 = vrot.slane %v1682_v30, %v6059_v43  ;;  %v4592_v32 = vpop.f32.mrb[15].mxu0  ;;  %v1759_v35 = vmul.f32 %v1682_v30, %v1682_v30 }
 0x6de   :  { %v1765_v33 = vsub.f32 %v1573_v2, %v1764_v31  ;;  %v1766_v34 = vsub.f32 %v1576_v5, %v1764_v31  ;;  %v5183_v2 = vld [vmem:[%s6555_s12 + $0x8] sm:$0xff]  }
 0x6eb   :  { %v1755_v36 = vpop.f32.mrb[16].mxu0 }
 0x6ec   :  { %v1760_v37 = vsub.f32 %v1755_v36, %v1759_v35  ;;  %v4611_v38 = vpop.f32.mrb[17].mxu0 }
 0x6ee   :  { %v1767_v39 = vadd.f32 1e-05, %v1760_v37 }
 0x6f0   :  { %5210 = vrsqrt.f32 %v1767_v39 }
 0x6fa   :  { %v5211_v40 = vpop.eup %5210 }
 0x6fb   :  { %v1772_v41 = vrot.slane %v5211_v40, %v6059_v43 }
 0x6fd   :  { %v1773_v44 = vmul.f32 %v1772_v41, %v1765_v33  ;;  %v1774_v45 = vmul.f32 %v1772_v41, %v1766_v34 }
 0x6ff   :  { %v1782_v47 = vmul.f32 %v3942_v42, %v1773_v44  ;;  %v1783_v48 = vmul.f32 %v3942_v42, %v1774_v45 }
 0x701   :  { %v1791_v49 = vadd.f32 %v3943_v46, %v1782_v47  ;;  %v1792_v50 = vadd.f32 %v3943_v46, %v1783_v48 }
 0x703   :  { %v1793_v51 = vmax.f32 %v1791_v49, 0.0  ;;  %v1794_v52 = vmax.f32 %v1792_v50, 0.0 }
 0x705   :  { %v5015_v53 = vpack.c.bf16 %v1794_v52, %v1793_v51 }
 0x707   :  { %5016 = vmatpush3.bf16.msra.mxu0 %v5015_v53 }
 0x708   :  { %5017 = vmatprep.subr.bf16.mxu0 %v5577_v29 }
 0x70a   :  { %4617 = vmatmul.mubr.msk.f32.vlgmr.msra.gmra.mrb[18].mxu0 %vm1796_vm3, %v1795_v54 }
 0x70b   :  { %5019 = vmatpush3.bf16.msra.mxu0 %v5015_v53  ;;  %4623 = vmatprep.mubr.msk.f32.mxu0 %vm5578_vm2, %v5579_v9 }
 0x70c   :  { %4626 = vmatprep.subr.bf16.mxu0 %v5579_v9 }
 0x70e   :  { %4624 = vmatmul.mubr.msk.f32.vlgmr.msra.gmra.mrb[20].mxu0 %vm1796_vm3, %v3945_v55 }
 0x70f   :  { %4627 = vmatpush3.bf16.msra.mxu0 %v5178_v56  ;;  %4634 = vmatprep.mubr.msk.bf16.mxu0 %vm5578_vm2, %v5579_v9 }
 0x710   :  { %4628 = vmatprep.subr.bf16.mxu0 %v5579_v9 }
 0x713   :  { %4629 = vmatpush3.bf16.msra.mxu0 %v5179_v57 }
 0x714   :  { %4630 = vmatprep.subr.bf16.mxu0 %v5579_v9 }
 0x717   :  { %4631 = vmatpush3.bf16.msra.mxu0 %v5180_v58 }
 0x718   :  { %4632 = vmatprep.subr.bf16.mxu0 %v5579_v9 }
 0x71b   :  { %4633 = vmatpush3.bf16.msra.mxu0 %v5181_v59 }
 0x71c   :  { %4638 = vmatprep.subr.bf16.mxu0 %v5579_v9 }
 0x7dd   :  { %v1866_v60 = vpop.f32.mrb[18].mxu0 }
 0x7de   :  { %v4618_v61 = vpop.f32.mrb[19].mxu0  ;;  %v1870_v5 = vpack.c.bf16 %v1866_v60, %v1866_v60 }
 0x7df   :  { %v3982_v61 = vld [vmem:[#allocation17] ss:$0 sm:$0xff] }
 0x7e1   :  { %v1950_v62 = vpop.f32.mrb[20].mxu0 }
 0x7e2   :  { %v1954_v0 = vpack.c.bf16 %v1950_v62, %v1950_v62  ;;  %v4625_v1 = vpop.f32.mrb[21].mxu0 }
 0x7e4   :  { %4635 = vmatmul.mubr.msk.bf16.vlgmr.msra.gmra.mrb[24].mxu0 %vm254_vm0, %v1954_v0 }
 0x7e5   :  { %4639 = vmatpush3.bf16.msra.mxu0 %v5182_v63  ;;  %4646 = vmatprep.mubr.msk.bf16.mxu0 %vm5578_vm2, %v5579_v9  ;;  %v3983_v63 = vld [vmem:[#allocation19] ss:$0 sm:$0xff] }
 0x7e6   :  { %4640 = vmatprep.subr.bf16.mxu0 %v5579_v9 }
 0x7e9   :  { %4641 = vmatpush3.bf16.msra.mxu0 %v5183_v2 }
 0x7ea   :  { %4642 = vmatprep.subr.bf16.mxu0 %v5579_v9 }
 0x7ed   :  { %4643 = vmatpush3.bf16.msra.mxu0 %v5184_v3  ;;  %v2454_v3 = vld [vmem:[#allocation20] sm:$0xf] }
 0x7ee   :  { %4644 = vmatprep.subr.bf16.mxu0 %v5579_v9 }
 0x7f1   :  { %4645 = vmatpush3.bf16.msra.mxu0 %v5185_v4  ;;  %v2758_v4 = vld [vmem:[#allocation20 + $0x8] sm:$0xf] }
 0x7f2   :  { %5020 = vmatprep.subr.bf16.mxu0 %v5577_v29 }
 0x7f4   :  { %4647 = vmatmul.mubr.msk.bf16.vlgmr.msra.gmra.mrb[24].mxu0 %vm254_vm0, %v1870_v5  ;;  %v2539_v5 = vld [vmem:[#allocation20 + $0x4] sm:$0xf] }
 0x7f5   :  { %5022 = vmatpush3.bf16.msra.mxu0 %v5015_v53  ;;  %4654 = vmatprep.mubr.msk.f32.mxu0 %vm5578_vm2, %v5579_v9 }
 0x7f6   :  { %4657 = vmatprep.subr.bf16.mxu0 %v5579_v9 }
 0x7fc   :  { %4655 = vmatmul.mubr.msk.f32.vlgmr.msra.gmra.mrb[22].mxu0 %vm1796_vm3, %v3965_v6  ;;  %v5190_v6 = vld [vmem:[%s6560_s17 + $0x20] sm:$0xff]  }
 0x7fd   :  { %4658 = vmatpush3.bf16.msra.mxu0 %v5186_v7  ;;  %4665 = vmatprep.mubr.msk.bf16.mxu0 %vm5578_vm2, %v5579_v9  ;;  %v5191_v7 = vld [vmem:[%s6560_s17 + $0x28] sm:$0xff]  }
 0x7fe   :  { %4659 = vmatprep.subr.bf16.mxu0 %v5579_v9 }
 0x801   :  { %4660 = vmatpush3.bf16.msra.mxu0 %v5187_v8  ;;  %v5192_v8 = vld [vmem:[%s6560_s17 + $0x30] sm:$0xff]  }
 0x802   :  { %4661 = vmatprep.subr.bf16.mxu0 %v5579_v9 }
 0x805   :  { %4662 = vmatpush3.bf16.msra.mxu0 %v5188_v10  ;;  %v5193_v10 = vld [vmem:[%s6560_s17 + $0x38] sm:$0xff]  }
 0x806   :  { %4663 = vmatprep.subr.bf16.mxu0 %v5579_v9 }
 0x809   :  { %4664 = vmatpush3.bf16.msra.mxu0 %v5189_v11 }
 0x80a   :  { %5035 = vmatprep.subr.bf16.mxu0 %v5577_v29 }
 0x8cf   :  { %v2169_v12 = vpop.f32.mrb[22].mxu0 }
 0x8d0   :  { %v2173_v13 = vpack.c.bf16 %v2169_v12, %v2169_v12  ;;  %v4656_v14 = vpop.f32.mrb[23].mxu0 }
 0x8d2   :  { %4666 = vmatmul.mubr.msk.bf16.vlgmr.msra.gmra.mrb[24].mxu0 %vm254_vm0, %v2173_v13 }
 0x8d3   :  { %4704 = vmatprep.mubr.msk.f32.mxu0 %vm5578_vm2, %v5579_v9  ;;  %5037 = vmatpush3.bf16.msra.mxu0 %v5024_v17 }
 0x8d4   :  { %5038 = vmatprep.subr.bf16.mxu0 %v5577_v29 }
 0x8d7   :  { %5040 = vmatpush3.bf16.msra.mxu0 %v5027_v20  ;;  %v5196_v20 = vld [vmem:[%s6560_s17 + $0x10] sm:$0xff]  }
 0x8d8   :  { %5041 = vmatprep.subr.bf16.mxu0 %v5577_v29 }
 0x8db   :  { %5043 = vmatpush3.bf16.msra.mxu0 %v5030_v23 }
 0x8dc   :  { %5044 = vmatprep.subr.bf16.mxu0 %v5577_v29 }
 0x8df   :  { %5046 = vmatpush3.bf16.msra.mxu0 %v5033_v26  ;;  %v5201_v26 = vld [vmem:[%s6560_s17 + $0x58] sm:$0xff]  }
 0x8e0   :  { %4741 = vmatprep.subr.mxu0 %v5579_v9 }
 0x9a5   :  { %v2244_v27 = vpop.f32.mrb[24].mxu0 }
 0x9a6   :  { %v2251_v28 = vsel %vm254_vm0, %v2244_v27, 0.0  ;;  %v2260_v30 = vmul.f32 %v2244_v27, %v2244_v27  ;;  %v4667_v31 = vpop.f32.mrb[25].mxu0 }
 0x9a7   :  { %v2252_v32 = vrot.slane %v2251_v28, 4  ;;  %v2247_v33 = vpop.f32.mrb[26].mxu0 }
 0x9a8   :  { %v2261_v34 = vsel %vm254_vm0, %v2260_v30, 0.0  ;;  %v4668_v35 = vpop.f32.mrb[27].mxu0  ;;  %v2930_v30 = vld [vmem:[#allocation22 + $0x8] sm:$0xff]  ;;  %v2932_v33 = vld [vmem:[#allocation22 + $0x18] sm:$0xff] }
 0x9a9   :  { %v2253_v36 = vadd.f32 %v2252_v32, %v2251_v28  ;;  %v2262_v37 = vrot.slane %v2261_v34, 4  ;;  %v2929_v28 = vld [vmem:[#allocation22] sm:$0xff]  ;;  %v2931_v32 = vld [vmem:[#allocation22 + $0x10] sm:$0xff] }
 0x9aa   :  { %v5048_v31 = vpack.c.bf16 %v2930_v30, %v2929_v28 }
 0x9ab   :  { %v2254_v38 = vrot.slane %v2253_v36, 2  ;;  %v2263_v39 = vadd.f32 %v2262_v37, %v2261_v34  ;;  %v5051_v34 = vpack.c.bf16 %v2932_v33, %v2931_v32  ;;  %v5204_v32 = vld [vmem:[%s6564_s21 + $0x10] sm:$0xff]  }
 0x9ad   :  { %v2255_v40 = vadd.f32 %v2254_v38, %v2253_v36  ;;  %v2264_v41 = vrot.slane %v2263_v39, 2 }
 0x9af   :  { %v2256_v42 = vrot.slane %v2255_v40, 1  ;;  %v2265_v44 = vadd.f32 %v2264_v41, %v2263_v39 }
 0x9b1   :  { %v2257_v45 = vadd.f32 %v2256_v42, %v2255_v40  ;;  %v2266_v46 = vrot.slane %v2265_v44, 1 }
 0x9b3   :  { %v2259_v47 = vmul.f32 0.125, %v2257_v45  ;;  %v2267_v48 = vadd.f32 %v2266_v46, %v2265_v44 }
 0x9b5   :  { %v2268_v49 = vmul.f32 0.125, %v2267_v48  ;;  %4686 = vmatmul.mubr.msk.f32.vlgmr.msra.gmra.mrb[16].mxu1 %vm254_vm0, %v2259_v47 }
 0x9b6   :  { %4709 = vmatprep.mubr.msk.f32.mxu1 %vm5578_vm2, %v5579_v9 }
 0x9b7   :  { %4705 = vmatmul.mubr.msk.f32.vlgmr.msra.gmra.mrb[28].mxu0 %vm254_vm0, %v2268_v49 }
 0x9b8   :  { %4743 = vmatprep.mubr.msk.f32.mxu0 %vm5578_vm2, %v5579_v9 }
 0xa88   :  { %v2346_v50 = vpop.f32.mrb[16].mxu1 }
 0xa89   :  { %v2423_v51 = vmul.f32 %v2346_v50, %v2346_v50  ;;  %v2428_v52 = vrot.slane %v2346_v50, %v6059_v43  ;;  %v4687_v53 = vpop.f32.mrb[17].mxu1 }
 0xa8a   :  { %v2419_v54 = vpop.f32.mrb[28].mxu0 }
 0xa8b   :  { %v2429_v55 = vsub.f32 %v2244_v27, %v2428_v52  ;;  %v2424_v56 = vsub.f32 %v2419_v54, %v2423_v51  ;;  %v4706_v57 = vpop.f32.mrb[29].mxu0 }
 0xa8c   :  { %v5202_v57 = vld [vmem:[%s6564_s21] sm:$0xff]  }
 0xa8d   :  { %v2430_v58 = vadd.f32 1e-05, %v2424_v56 }
 0xa8f   :  { %5212 = vrsqrt.f32 %v2430_v58  ;;  %v5203_v58 = vld [vmem:[%s6564_s21 + $0x8] sm:$0xff]  }
 0xa99   :  { %v5213_v59 = vpop.eup %5212 }
 0xa9a   :  { %v2435_v60 = vrot.slane %v5213_v59, %v6059_v43  ;;  %v3310_v59 = vld [vmem:[%s6566_s23] sm:$0xff] }
 0xa9c   :  { %v2436_v62 = vmul.f32 %v2435_v60, %v2429_v55  ;;  %v3311_v60 = vld [vmem:[%s6566_s23 + $0x8] sm:$0xff] }
 0xa9e   :  { %v2444_v0 = vmul.f32 %v3982_v61, %v2436_v62  ;;  %v6412_v61 = vpack.c.bf16 %v3311_v60, %v3310_v59  ;;  %v3312_v62 = vld [vmem:[%s6566_s23 + $0x10] sm:$0xff] }
 0xaa0   :  { %v2452_v1 = vadd.f32 %v3983_v63, %v2444_v0  ;;  %v3313_v63 = vld [vmem:[%s6566_s23 + $0x18] sm:$0xff] }
 0xaa1   :  { %v6422_v0 = vpack.c.bf16 %v3313_v63, %v3312_v62 }
 0xaa2   :  { %v2453_v2 = vmax.f32 %v2452_v1, 0.0  ;;  %v4048_v1 = vld [vmem:[%s6566_s23 + $0x40] sm:$0xff] }
 0xaa4   :  { %4708 = vmatpush3.msra.mxu1 %v2453_v2  ;;  %4742 = vmatpush3.msra.mxu0 %v2453_v2 }
 0xaa5   :  { %4710 = vmatmul.mubr.msk.f32.vlgmr.msra.gmra.mrb[18].mxu1 %vm2455_vm4, %v2454_v3  ;;  %4712 = vmatprep.subr.mxu1 %v5579_v9  ;;  %v4050_v3 = vld [vmem:[%s6566_s23 + $0x50] sm:$0xff] }
 0xaa6   :  { %4713 = vmatpush3.msra.mxu1 %v2453_v2  ;;  %4714 = vmatprep.mubr.msk.f32.mxu1 %vm5578_vm2, %v5579_v9  ;;  %v4049_v2 = vld [vmem:[%s6566_s23 + $0x48] sm:$0xff] }
 0xaa7   :  { %4744 = vmatmul.mubr.msk.f32.vlgmr.msra.gmra.mrb[30].mxu0 %vm2455_vm4, %v2758_v4  ;;  %4717 = vmatprep.subr.bf16.mxu1 %v5579_v9  ;;  %v6438_v4 = vpack.c.bf16 %v4049_v2, %v4048_v1 }
 0xaa8   :  { %5047 = vmatprep.subr.bf16.mxu0 %v5577_v29  ;;  %4766 = vmatprep.mubr.msk.f32.mxu0 %vm5578_vm2, %v5579_v9 }
 0xaa9   :  { %4715 = vmatmul.mubr.msk.f32.vlgmr.msra.gmra.mrb[20].mxu1 %vm2455_vm4, %v2539_v5  ;;  %5049 = vmatpush3.bf16.msra.mxu0 %v5048_v31  ;;  %v4051_v5 = vld [vmem:[%s6566_s23 + $0x58] sm:$0xff] }
 0xaaa   :  { %4718 = vmatpush3.bf16.msra.mxu1 %v5190_v6  ;;  %4725 = vmatprep.mubr.msk.bf16.mxu1 %vm5578_vm2, %v5579_v9  ;;  %v6444_v6 = vpack.c.bf16 %v4051_v5, %v4050_v3 }
 0xaab   :  { %4719 = vmatprep.subr.bf16.mxu1 %v5579_v9  ;;  %5050 = vmatprep.subr.bf16.mxu0 %v5577_v29 }
 0xaad   :  { %5052 = vmatpush3.bf16.msra.mxu0 %v5051_v34 }
 0xaae   :  { %4720 = vmatpush3.bf16.msra.mxu1 %v5191_v7  ;;  %5053 = vmatprep.subr.bf16.mxu0 %v5577_v29  ;;  %v4044_v7 = vld [vmem:[%s6566_s23 + $0x20] sm:$0xff] }
 0xaaf   :  { %4721 = vmatprep.subr.bf16.mxu1 %v5579_v9 }
 0xab2   :  { %4722 = vmatpush3.bf16.msra.mxu1 %v5192_v8  ;;  %v4045_v8 = vld [vmem:[%s6566_s23 + $0x28] sm:$0xff] }
 0xab3   :  { %4723 = vmatprep.subr.bf16.mxu1 %v5579_v9 }
 0xab6   :  { %4724 = vmatpush3.bf16.msra.mxu1 %v5193_v10  ;;  %v5066_v10 = vpack.c.bf16 %v4045_v8, %v4044_v7 }
 0xab7   :  { %4729 = vmatprep.subr.bf16.mxu1 %v5579_v9 }
 0xb78   :  { %v2525_v11 = vpop.f32.mrb[18].mxu1 }
 0xb79   :  { %v4711_v12 = vpop.f32.mrb[19].mxu1  ;;  %v2529_v23 = vpack.c.bf16 %v2525_v11, %v2525_v11  ;;  %v4046_v11 = vld [vmem:[%s6566_s23 + $0x30] sm:$0xff] }
 0xb7a   :  { %v2828_v13 = vpop.f32.mrb[30].mxu0  ;;  %v4047_v12 = vld [vmem:[%s6566_s23 + $0x38] sm:$0xff] }
 0xb7b   :  { %v4745_v14 = vpop.f32.mrb[31].mxu0  ;;  %v2832_v27 = vpack.c.bf16 %v2828_v13, %v2828_v13  ;;  %v5069_v13 = vpack.c.bf16 %v4047_v12, %v4046_v11  ;;  %v4056_v12 = vld [vmem:[%s6603_s0 + $0x2] ss:$0 sm:$0xff] }
 0xb7c   :  { %v2609_v15 = vpop.f32.mrb[20].mxu1 }
 0xb7d   :  { %v2613_v17 = vpack.c.bf16 %v2609_v15, %v2609_v15  ;;  %v4716_v18 = vpop.f32.mrb[21].mxu1 }
 0xb7f   :  { %4726 = vmatmul.mubr.msk.bf16.vlgmr.msra.gmra.mrb[24].mxu1 %vm254_vm0, %v2613_v17 }
 0xb80   :  { %4730 = vmatpush3.bf16.msra.mxu1 %v5194_v16  ;;  %4737 = vmatprep.mubr.msk.bf16.mxu1 %vm5578_vm2, %v5579_v9 }
 0xb81   :  { %4731 = vmatprep.subr.bf16.mxu1 %v5579_v9 }
 0xb84   :  { %4732 = vmatpush3.bf16.msra.mxu1 %v5195_v19 }
 0xb85   :  { %4733 = vmatprep.subr.bf16.mxu1 %v5579_v9 }
 0xb88   :  { %4734 = vmatpush3.bf16.msra.mxu1 %v5196_v20 }
 0xb89   :  { %4735 = vmatprep.subr.bf16.mxu1 %v5579_v9 }
 0xb8c   :  { %4736 = vmatpush3.bf16.msra.mxu1 %v5197_v21 }
 0xb8d   :  { %4746 = vmatprep.subr.bf16.mxu1 %v5579_v9 }
 0xb8f   :  { %4738 = vmatmul.mubr.msk.bf16.vlgmr.msra.gmra.mrb[24].mxu1 %vm254_vm0, %v2529_v23 }
 0xb90   :  { %4747 = vmatpush3.bf16.msra.mxu1 %v5198_v22  ;;  %4754 = vmatprep.mubr.msk.bf16.mxu1 %vm5578_vm2, %v5579_v9 }
 0xb91   :  { %4748 = vmatprep.subr.bf16.mxu1 %v5579_v9 }
 0xb94   :  { %4749 = vmatpush3.bf16.msra.mxu1 %v5199_v24 }
 0xb95   :  { %4750 = vmatprep.subr.bf16.mxu1 %v5579_v9 }
 0xb98   :  { %4751 = vmatpush3.bf16.msra.mxu1 %v5200_v25  ;;  %v4020_v25 = vld [vmem:[#allocation23] ss:$0 sm:$0xff] }
 0xb99   :  { %4752 = vmatprep.subr.bf16.mxu1 %v5579_v9 }
 0xb9c   :  { %4753 = vmatpush3.bf16.msra.mxu1 %v5201_v26 }
 0xb9d   :  { %5059 = vmatprep.subr.bf16.mxu1 %v5577_v29 }
 0xb9f   :  { %4755 = vmatmul.mubr.msk.bf16.vlgmr.msra.gmra.mrb[24].mxu1 %vm254_vm0, %v2832_v27  ;;  %v4021_v27 = vld [vmem:[#allocation25] ss:$0 sm:$0xff] }
 0xba0   :  { %4812 = vmatprep.mubr.msk.f32.mxu1 %vm5578_vm2, %v5579_v9  ;;  %5061 = vmatpush3.bf16.msra.mxu1 %v6412_v61 }
 0xba1   :  { %5062 = vmatprep.subr.bf16.mxu1 %v5577_v29 }
 0xba4   :  { %5064 = vmatpush3.bf16.msra.mxu1 %v6422_v0 }
 0xba5   :  { %5071 = vmatprep.subr.bf16.mxu1 %v5577_v29 }
 0xba7   :  { %4813 = vmatmul.mubr.f32.vlgmr.msra.gmra.mrb[22].mxu1 %v5579_v9 }
 0xba8   :  { %4834 = vmatprep.mubr.msk.f32.mxu1 %vm5578_vm2, %v5579_v9  ;;  %5073 = vmatpush3.bf16.msra.mxu1 %v6438_v4 }
 0xba9   :  { %5074 = vmatprep.subr.bf16.mxu1 %v5577_v29 }
 0xbac   :  { %5076 = vmatpush3.bf16.msra.mxu1 %v6444_v6 }
 0xbad   :  { %5083 = vmatprep.subr.bf16.mxu1 %v5577_v29 }
 0xbaf   :  { %4835 = vmatmul.mubr.f32.vlgmr.msra.gmra.mrb[28].mxu1 %v5579_v9 }
 0xbb0   :  { %5085 = vmatpush3.bf16.msra.mxu1 %v5066_v10  ;;  %4856 = vmatprep.mubr.msk.f32.mxu1 %vm5578_vm2, %v5579_v9 }
 0xbb1   :  { %5086 = vmatprep.subr.bf16.mxu1 %v5577_v29 }
 0xbb4   :  { %5088 = vmatpush3.bf16.msra.mxu1 %v5069_v13 }
 0xc72   :  { %v6383_v35 = vpop.f32.mrb[24].mxu1 }
 0xc73   :  { %v2911_v36 = vsel %vm2910_vm5, %v6383_v35, 0.0  ;;  %v2920_v37 = vmul.f32 %v6383_v35, %v6383_v35  ;;  %v4756_v38 = vpop.f32.mrb[25].mxu1 }
 0xc74   :  { %v2912_v39 = vrot.slane %v2911_v36, 4  ;;  %v2906_v40 = vpop.f32.mrb[26].mxu1 }
 0xc75   :  { %v2921_v41 = vsel %vm2910_vm5, %v2920_v37, 0.0  ;;  %v4757_v42 = vpop.f32.mrb[27].mxu1  ;;  %v4022_v40 = vld [vmem:[%s6565_s22] ss:$0 sm:$0xff] }
 0xc76   :  { %v2913_v44 = vadd.f32 %v2912_v39, %v2911_v36  ;;  %v2922_v45 = vrot.slane %v2921_v41, 4 }
 0xc78   :  { %v2914_v46 = vrot.slane %v2913_v44, 2  ;;  %v2923_v47 = vadd.f32 %v2922_v45, %v2921_v41 }
 0xc7a   :  { %v2915_v48 = vadd.f32 %v2914_v46, %v2913_v44  ;;  %v2924_v49 = vrot.slane %v2923_v47, 2  ;;  %v3407_v36 = vpop.f32.mrb[22].mxu1 }
 0xc7b   :  { %v4814_v37 = vpop.f32.mrb[23].mxu1 }
 0xc7c   :  { %v2916_v50 = vrot.slane %v2915_v48, 1  ;;  %v2925_v51 = vadd.f32 %v2924_v49, %v2923_v47  ;;  %v4054_v47 = vld [vmem:[%s6603_s0] ss:$0 sm:$0xff] }
 0xc7d   :  { %v3408_v49 = vadd.f32 %v4054_v47, %v3407_v36 }
 0xc7e   :  { %v2917_v52 = vadd.f32 %v2916_v50, %v2915_v48  ;;  %v2926_v54 = vrot.slane %v2925_v51, 1  ;;  %v4031_v48 = vld [vmem:[%s6565_s22 + $0x1] ss:$0 sm:$0xff] }
 0xc80   :  { %v2919_v53 = vmul.f32 0.25, %v2917_v52  ;;  %v2927_v55 = vadd.f32 %v2926_v54, %v2925_v51 }
 0xc82   :  { %4767 = vmatmul.mubr.msk.f32.vlgmr.msra.gmra.mrb[32].mxu0 %vm479_vm1, %v2919_v53  ;;  %v2928_v56 = vmul.f32 0.25, %v2927_v55  ;;  %v3559_v38 = vpop.f32.mrb[28].mxu1 }
 0xc83   :  { %5055 = vmatpush3.bf16.msra.mxu0 %v5048_v31  ;;  %4777 = vmatprep.mubr.msk.f32.mxu0 %vm5578_vm2, %v5579_v9  ;;  %v4836_v39 = vpop.f32.mrb[29].mxu1 }
 0xc84   :  { %5056 = vmatprep.subr.bf16.mxu0 %v5577_v29 }
 0xc87   :  { %5058 = vmatpush3.bf16.msra.mxu0 %v5051_v34  ;;  %v5205_v34 = vld [vmem:[%s6564_s21 + $0x18] sm:$0xff]  }
 0xc88   :  { %4780 = vmatprep.subr.bf16.mxu0 %v5579_v9 }
 0xc8a   :  { %4778 = vmatmul.mubr.msk.f32.vlgmr.msra.gmra.mrb[34].mxu0 %vm479_vm1, %v2928_v56 }
 0xc8b   :  { %4784 = vmatprep.mubr.msk.bf16.mxu0 %vm5578_vm2, %v5579_v9  ;;  %4781 = vmatpush3.bf16.msra.mxu0 %v5202_v57 }
 0xc8c   :  { %4782 = vmatprep.subr.bf16.mxu0 %v5579_v9 }
 0xc8f   :  { %4783 = vmatpush3.bf16.msra.mxu0 %v5203_v58  ;;  %v4040_v58 = vld [vmem:[%s6565_s22 + $0x2] ss:$0 sm:$0xff] }
 0xc90   :  { %4788 = vmatprep.subr.bf16.mxu0 %v5579_v9 }
 0xd55   :  { %v3002_v14 = vpop.f32.mrb[32].mxu0 }
 0xd56   :  { %v3084_v15 = vrot.slane %v3002_v14, %v6059_v43  ;;  %v4768_v16 = vpop.f32.mrb[33].mxu0  ;;  %v3079_v18 = vmul.f32 %v3002_v14, %v3002_v14 }
 0xd58   :  { %v3085_v17 = vsub.f32 %v6383_v35, %v3084_v15  ;;  %v5207_v35 = vld [vmem:[%s6564_s21 + $0x28] sm:$0xff]  }
 0xd5d   :  { %v3075_v19 = vpop.f32.mrb[34].mxu0 }
 0xd5e   :  { %v3080_v20 = vsub.f32 %v3075_v19, %v3079_v18  ;;  %v4779_v21 = vpop.f32.mrb[35].mxu0 }
 0xd60   :  { %v3086_v22 = vadd.f32 1e-05, %v3080_v20 }
 0xd62   :  { %5214 = vrsqrt.f32 %v3086_v22 }
 0xd6c   :  { %v5215_v23 = vpop.eup %5214 }
 0xd6d   :  { %v3091_v24 = vrot.slane %v5215_v23, %v6059_v43  ;;  %v5206_v43 = vld [vmem:[%s6564_s21 + $0x20] sm:$0xff]  }
 0xd6f   :  { %v3092_v26 = vmul.f32 %v3091_v24, %v3085_v17 }
 0xd71   :  { %v3100_v28 = vmul.f32 %v4020_v25, %v3092_v26 }
 0xd73   :  { %v3108_v30 = vadd.f32 %v4021_v27, %v3100_v28 }
 0xd75   :  { %v3109_v31 = vmax.f32 %v3108_v30, 0.0 }
 0xd77   :  { %v3110_v33 = vpack.c.bf16 %v3109_v31, %v3109_v31 }
 0xd79   :  { %4785 = vmatmul.mubr.msk.bf16.vlgmr.msra.gmra.mrb[36].mxu0 %vm479_vm1, %v3110_v33 }
 0xd7a   :  { %4789 = vmatpush3.bf16.msra.mxu0 %v5204_v32  ;;  %4792 = vmatprep.mubr.msk.bf16.mxu0 %vm5578_vm2, %v5579_v9 }
 0xd7b   :  { %4790 = vmatprep.subr.bf16.mxu0 %v5579_v9 }
 0xd7e   :  { %4791 = vmatpush3.bf16.msra.mxu0 %v5205_v34 }
 0xd7f   :  { %4796 = vmatprep.subr.bf16.mxu0 %v5579_v9 }
 0xd81   :  { %4793 = vmatmul.mubr.msk.bf16.vlgmr.msra.gmra.mrb[40].mxu0 %vm479_vm1, %v3110_v33 }
 0xd82   :  { %4797 = vmatpush3.bf16.msra.mxu0 %v5206_v43  ;;  %4800 = vmatprep.mubr.msk.bf16.mxu0 %vm5578_vm2, %v5579_v9 }
 0xd83   :  { %4798 = vmatprep.subr.bf16.mxu0 %v5579_v9 }
 0xd86   :  { %4799 = vmatpush3.bf16.msra.mxu0 %v5207_v35 }
 0xd87   :  { %5065 = vmatprep.subr.bf16.mxu0 %v5577_v29 }
 0xd89   :  { %4801 = vmatmul.mubr.msk.bf16.vlgmr.msra.gmra.mrb[44].mxu0 %vm479_vm1, %v3110_v33 }
 0xd8a   :  { %5067 = vmatpush3.bf16.msra.mxu0 %v5066_v10  ;;  %4823 = vmatprep.mubr.msk.f32.mxu0 %vm5578_vm2, %v5579_v9 }
 0xd8b   :  { %5068 = vmatprep.subr.bf16.mxu0 %v5577_v29 }
 0xd8e   :  { %5070 = vmatpush3.bf16.msra.mxu0 %v5069_v13  ;;  %v3560_v13 = vadd.f32 %v4056_v12, %v3559_v38 }
 0xd8f   :  { %5077 = vmatprep.subr.bf16.mxu0 %v5577_v29 }
 0xd91   :  { %4824 = vmatmul.mubr.f32.vlgmr.msra.gmra.mrb[48].mxu0 %v5579_v9 }
 0xd92   :  { %5079 = vmatpush3.bf16.msra.mxu0 %v6412_v61  ;;  %4845 = vmatprep.mubr.msk.f32.mxu0 %vm5578_vm2, %v5579_v9 }
 0xd93   :  { %5080 = vmatprep.subr.bf16.mxu0 %v5577_v29 }
 0xd96   :  { %5082 = vmatpush3.bf16.msra.mxu0 %v6422_v0  ;;  %v4055_v0 = vld [vmem:[%s6603_s0 + $0x1] ss:$0 sm:$0xff] }
 0xd97   :  { %5089 = vmatprep.subr.bf16.mxu0 %v5577_v29 }
 0xe4c   :  { %v3171_v41 = vpop.f32.mrb[36].mxu0 }
 0xe4d   :  { %v3172_v42 = vadd.f32 %v4022_v40, %v3171_v41  ;;  %v4786_v44 = vpop.f32.mrb[37].mxu0 }
 0xe4e   :  { %v3174_v45 = vpop.f32.mrb[38].mxu0 }
 0xe4f   :  { %3177 = vst.msk [vmem:[#allocation2] sm:$0xf] %vm2910_vm5, %v3172_v42  ;;  %v4787_v46 = vpop.f32.mrb[39].mxu0 }
 0xe54   :  { %v3237_v50 = vpop.f32.mrb[40].mxu0 }
 0xe55   :  { %v3238_v51 = vadd.f32 %v4031_v48, %v3237_v50  ;;  %v4794_v52 = vpop.f32.mrb[41].mxu0 }
 0xe56   :  { %v3329_v53 = vld [vmem:[#allocation2] sm:$0x3]  ;;  %v3240_v54 = vpop.f32.mrb[42].mxu0  ;;  %v3584_v32 = vld [vmem:[#allocation2 + $0x2] sm:$0x3] }
 0xe57   :  { %3243 = vst.msk [vmem:[#allocation3] sm:$0xf] %vm2910_vm5, %v3238_v51  ;;  %v3563_v55 = vadd.f32 %v3408_v49, %v3329_v53  ;;  %v4795_v56 = vpop.f32.mrb[43].mxu0 }
 0xe59   :  { %v4057_v57 = vmul.f32 -1.442695, %v3563_v55 }
 0xe5b   :  { %5216 = vpow2.f32 %v4057_v57 }
 0xe5c   :  { %v3303_v59 = vpop.f32.mrb[44].mxu0 }
 0xe5d   :  { %v3304_v60 = vadd.f32 %v4040_v58, %v3303_v59  ;;  %v4802_v61 = vpop.f32.mrb[45].mxu0 }
 0xe5e   :  { %v3306_v62 = vpop.f32.mrb[46].mxu0  ;;  %v3330_v8 = vld [vmem:[#allocation3] sm:$0x3]  ;;  %v3585_v35 = vld [vmem:[#allocation3 + $0x2] sm:$0x3] }
 0xe5f   :  { %3309 = vst.msk [vmem:[#allocation4] sm:$0xf] %vm2910_vm5, %v3304_v60  ;;  %v4803_v63 = vpop.f32.mrb[47].mxu0 }
 0xe64   :  { %v3483_v1 = vpop.f32.mrb[48].mxu0 }
 0xe65   :  { %v5217_v2 = vpop.eup %5216  ;;  %v3484_v3 = vadd.f32 %v4055_v0, %v3483_v1  ;;  %v4825_v5 = vpop.f32.mrb[49].mxu0 }
 0xe66   :  { %v3567_v7 = vadd.f32 1.0, %v5217_v2  ;;  %v3331_v17 = vld [vmem:[#allocation4] sm:$0x3]  ;;  %v3586_v44 = vld [vmem:[#allocation4 + $0x2] sm:$0x3] }
 0xe67   :  { %v3570_v10 = vadd.f32 %v3484_v3, %v3330_v8 }
 0xe68   :  { %5218 = vrcp.f32 %v3567_v7 }
 0xe69   :  { %v4058_v11 = vmul.f32 -1.442695, %v3570_v10 }
 0xe6b   :  { %5220 = vpow2.f32 %v4058_v11 }
 0xe72   :  { %v5219_v14 = vpop.eup %5218 }
 0xe73   :  { %v3577_v15 = vmul.f32 %v5219_v14, %v3560_v13 }
 0xe75   :  { %v5221_v16 = vpop.eup %5220  ;;  %v3578_v19 = vadd.f32 %v3577_v15, %v3331_v17 }
 0xe76   :  { %v3574_v18 = vadd.f32 1.0, %v5221_v16 }
 0xe78   :  { %5222 = vrcp.f32 %v3574_v18 }
 0xe79   :  { %5224 = vtanh.f32 %v3578_v19 }
 0xe82   :  { %v5223_v20 = vpop.eup %5222 }
 0xe83   :  { %v3580_v21 = vsub.f32 1.0, %v5223_v20  ;;  %v5225_v22 = vpop.eup %5224  ;;  %v3582_v24 = vmul.f32 0.0, %v5223_v20 }
 0xe85   :  { %v3581_v23 = vmul.f32 %v5225_v22, %v3580_v21 }
 0xe87   :  { %v3583_v25 = vadd.f32 %v3582_v24, %v3581_v23 }
 0xe89   :  { %4846 = vmatmul.mubr.msk.f32.vlgmr.msra.gmra.mrb[50].mxu0 %vm479_vm1, %v3583_v25  ;;  %4857 = vmatmul.mubr.msk.f32.vlgmr.msra.gmra.mrb[30].mxu1 %vm479_vm1, %v3583_v25 }
 0xe8a   :  { %5091 = vmatpush3.bf16.msra.mxu0 %v6438_v4  ;;  %4867 = vmatprep.mubr.msk.f32.mxu0 %vm5578_vm2, %v5579_v9 }
 0xe8b   :  { %5092 = vmatprep.subr.bf16.mxu0 %v5577_v29 }
 0xe8e   :  { %5094 = vmatpush3.bf16.msra.mxu0 %v6444_v6 }
 0xe91   :  { %4868 = vmatmul.mubr.msk.f32.vlgmr.msra.gmra.mrb[52].mxu0 %vm479_vm1, %v3583_v25 }
 0xf5c   :  { %v3656_v26 = vpop.f32.mrb[50].mxu0  ;;  %v3726_v27 = vpop.f32.mrb[30].mxu1 }
 0xf5d   :  { %v3657_v28 = vadd.f32 %v4054_v47, %v3656_v26  ;;  %v4847_v30 = vpop.f32.mrb[51].mxu0  ;;  %v4858_v31 = vpop.f32.mrb[31].mxu1  ;;  %v3727_v33 = vadd.f32 %v4055_v0, %v3726_v27 }
 0xf5f   :  { %v3800_v34 = vadd.f32 %v3657_v28, %v3584_v32  ;;  %v3807_v4 = vadd.f32 %v3727_v33, %v3585_v35 }
 0xf61   :  { %v4062_v43 = vmul.f32 -1.442695, %v3800_v34  ;;  %v4063_v37 = vmul.f32 -1.442695, %v3807_v4 }
 0xf63   :  { %5226 = vpow2.f32 %v4062_v43 }
 0xf64   :  { %v3796_v36 = vpop.f32.mrb[52].mxu0  ;;  %5228 = vpow2.f32 %v4063_v37 }
 0xf65   :  { %v4869_v9 = vpop.f32.mrb[53].mxu0  ;;  %v3797_v40 = vadd.f32 %v4056_v12, %v3796_v36 }
 0xf6d   :  { %v5227_v29 = vpop.eup %5226 }
 0xf6e   :  { %v3804_v6 = vadd.f32 1.0, %v5227_v29  ;;  %v5229_v38 = vpop.eup %5228 }
 0xf6f   :  { %v3811_v39 = vadd.f32 1.0, %v5229_v38 }
 0xf70   :  { %5230 = vrcp.f32 %v3804_v6 }
 0xf71   :  { %5232 = vrcp.f32 %v3811_v39 }
 0xf7a   :  { %v5231_v41 = vpop.eup %5230 }
 0xf7b   :  { %v3814_v42 = vmul.f32 %v5231_v41, %v3797_v40  ;;  %v5233_v46 = vpop.eup %5232 }
 0xf7c   :  { %v3817_v47 = vsub.f32 1.0, %v5233_v46  ;;  %v3819_v50 = vmul.f32 %v5233_v46, %v3583_v25 }
 0xf7d   :  { %v3815_v45 = vadd.f32 %v3814_v42, %v3586_v44 }
 0xf7f   :  { %5234 = vtanh.f32 %v3815_v45 }
 0xf89   :  { %v5235_v48 = vpop.eup %5234 }
 0xf8a   :  { %v3818_v49 = vmul.f32 %v5235_v48, %v3817_v47 }
 0xf8c   :  { %v3820_v51 = vadd.f32 %v3819_v50, %v3818_v49 }
 0xf8e   :  { %3822 = vst.msk [vmem:[#allocation26] sm:$0x3] %vm3821_vm6, %v3820_v51 }
 0xf8f   :  { %5533 = shalt.err (!%p5530_p10)
}
 0xf90   :  { %s6604_s27 = sld [smem:[#allocation46_spill]] }
 0xf96   :  { %s5534_s8 = scalar_lea.hbm %s6604_s27, 32 }
 0xf97   :  { %p5535_p11 = scmp.ne.s32.totalorder %s6604_s27, %s5534_s8  ;;  %p5538_p12 = scmp.lt.u32.totalorder %s5534_s8, %s6604_s27 }
 0xf99   :  { %p5540_p13 = pnand %p5538_p12, %p5535_p11 }
 0xf9b   :  { %5543 = shalt.err (!%p5540_p13)
}
 0xf9c   :  { %3832 = dma.vmem_to_hbm [thread:$0]  %s3830_s15, 32, %s6604_s27, [#allocation7]  }
 0xf9d   :  { %5558 = dma.done.wait [#allocation7], 32  }
 0xf9e   :  { %5559 = vsyncadd [#allocation7], 4294967264 }
 0xf9f   :  { %3836 = vsyncpa [#allocation6], 1 }
 0xfa0   :  { %3837 = vsyncpa [#allocation9], 1 }
 0xfa1   :  { %3838 = vsyncpa [#allocation12], 1 }
 0xfa2   :  { %3839 = vsyncpa [#allocation15], 1 }
 0xfa3   :  { %3840 = vsyncpa [#allocation18], 1 }
 0xfa4   :  { %3841 = vsyncpa [#allocation21], 1 }
 0xfa5   :  { %3842 = vsyncpa [#allocation24], 1 }
 0xfa6   :  { %3843 = vsyncpa [#allocation7], 1 }

</bundles_post_ra>
